<compile_context>
chip_gen: v7x
topology: tpu7x:2x2x1
jax: 0.10.0
libtpu: 0.0.40
codegen_flags: <defaults>
</compile_context>

<pallas_src>
import jax
import jax.numpy as jnp
from jax.experimental import pallas as pl
from jax.experimental.pallas import tpu as pltpu

NUM_CLASSES = 5          # len(cls_counts) = len([62, 206, 297, 5107, 1526])
FEAT_DIM = 2048          # Linear(2048, num_classes) in_features


def arnet_head_kernel(x_ref, w_ref, b_ref, out_ref, acc_ref):
    """x_ref: (TN, TP, C) feature tile; w_ref: (C, nc) weights pre-scaled by 1/P;
    b_ref: (1, nc); out_ref: (TN, nc); acc_ref: (TN, C) f32 running sum."""
    p = pl.program_id(1)

    @pl.when(p == 0)
    def _init():
        acc_ref[...] = jnp.zeros_like(acc_ref)

    # Sum this tile's positions; cast to f32 before accumulating so bf16
    # inputs stay on the fast VPU path and the mean keeps f32 precision.
    acc_ref[...] += jnp.sum(x_ref[...].astype(jnp.float32), axis=1)

    @pl.when(p == pl.num_programs(1) - 1)
    def _finalize():
        # w is pre-scaled by 1/P, so acc_sum @ w == mean(x) @ w_orig.
        logits = jnp.dot(acc_ref[...], w_ref[...],
                         preferred_element_type=jnp.float32)
        out_ref[...] = logits + b_ref[...]


def arnet_forward(x, w, b, *, tn=8, tp=128):
    """x: (N, P, C) f32/bf16; w: (C, nc) f32; b: (1, nc) f32 -> (N, nc) f32."""
    N, P, C = x.shape
    nc = w.shape[1]

    tn = min(tn, N)
    tp = min(tp, P)

    # Pad N / P up to tile multiples with zeros (zeros along P do not change
    # the sum; we scale by the *true* 1/P via the pre-scaled weights below).
    n_pad = pl.cdiv(N, tn) * tn
    p_pad = pl.cdiv(P, tp) * tp
    if (n_pad, p_pad) != (N, P):
        x = jnp.pad(x, ((0, n_pad - N), (0, p_pad - P), (0, 0)))

    # Fold avg-pool + AvgConsensus (a single uniform mean over P) into w.
    # Exact because every segment contributes the same T*H*W position count.
    w_scaled = w.astype(jnp.float32) * jnp.float32(1.0 / P)
    b = b.astype(jnp.float32)

    grid = (n_pad // tn, p_pad // tp)

    cost = pl.CostEstimate(
        flops=n_pad * p_pad * C + 2 * N * C * nc,
        transcendentals=0,
        bytes_accessed=(x.size * x.dtype.itemsize
                        + w_scaled.size * 4 + b.size * 4 + n_pad * nc * 4),
    )

    out = pl.pallas_call(
        arnet_head_kernel,
        out_shape=jax.ShapeDtypeStruct((n_pad, nc), jnp.float32),
        grid_spec=pltpu.PrefetchScalarGridSpec(
            num_scalar_prefetch=0,
            grid=grid,
            in_specs=[
                pl.BlockSpec((tn, tp, C), lambda n, p: (n, p, 0)),
                pl.BlockSpec((C, nc), lambda n, p: (0, 0)),   # resident weights
                pl.BlockSpec((1, nc), lambda n, p: (0, 0)),   # resident bias
            ],
            out_specs=pl.BlockSpec((tn, nc), lambda n, p: (n, 0)),
            scratch_shapes=[pltpu.VMEM((tn, C), jnp.float32)],
        ),
        compiler_params=pltpu.CompilerParams(
            dimension_semantics=("parallel", "arbitrary")),
        cost_estimate=cost,
    )(x, w_scaled, b)

    return out[:N]


if __name__ == "__main__":
    key = jax.random.PRNGKey(0)
    k_x, k_w = jax.random.split(key)

    # Small synthetic shapes consistent with the module's forward:
    #   batch N=2, num_segments S=4, flattened T*H*W = 16 per segment, C=2048.
    N, S, THW = 2, 4, 16
    P = S * THW

    # Per-segment backbone features (stand-in for the I3D trunk output),
    # shipped as bf16 to halve HBM traffic; the kernel accumulates in f32.
    x = jax.random.normal(k_x, (N, P, FEAT_DIM), dtype=jnp.float32)
    x_bf16 = x.astype(jnp.bfloat16)

    # mlp = nn.Linear(2048, num_classes); normal_init(std=0.01): W~N(0,0.01), b=0.
    w_torch = 0.01 * jax.random.normal(k_w, (NUM_CLASSES, FEAT_DIM), dtype=jnp.float32)
    w = jnp.transpose(w_torch)                         # (2048, 5) for x @ W.T
    b = jnp.zeros((1, NUM_CLASSES), dtype=jnp.float32)

    # Small P tile so the demo exercises the multi-step reduction pipeline.
    out = arnet_forward(x_bf16, w, b, tn=8, tp=16)
    out = jax.block_until_ready(out)

    # Pure-JAX reference of the same semantics (pool -> consensus -> linear).
    ref = jnp.mean(x_bf16.astype(jnp.float32), axis=1) @ w + b
    assert out.shape == (N, NUM_CLASSES)
    assert jnp.allclose(out, ref, atol=1e-4, rtol=1e-4)

    print("KERNEL_OK")
</pallas_src>

<mosaic_0001>
module attributes {stable_mosaic.version = 11 : i64} {
  func.func @arnet_head_kernel(%arg0: i32, %arg1: i32, %arg2: memref<2x16x2048xbf16, #tpu.memory_space<vmem>>, %arg3: memref<2048x5xf32, #tpu.memory_space<vmem>>, %arg4: memref<1x5xf32, #tpu.memory_space<vmem>>, %arg5: memref<2x5xf32, #tpu.memory_space<vmem>>, %arg6: memref<2x2048xf32, #tpu.memory_space<vmem>>) attributes {dimension_semantics = [#tpu.dimension_semantics<parallel>, #tpu.dimension_semantics<arbitrary>], iteration_bounds = array<i64: 1, 4>, scalar_prefetch = 0 : i64, scratch_operands = 1 : i64, tpu.core_type = #tpu.core_type<tc>, window_params = [{transform_indices = @transform_0, window_bounds = array<i64: 2, 16, 2048>}, {pipeline_mode = #tpu.pipeline_mode<synchronous>, transform_indices = @transform_1, window_bounds = array<i64: 2048, 5>}, {pipeline_mode = #tpu.pipeline_mode<synchronous>, transform_indices = @transform_2, window_bounds = array<i64: 1, 5>}, {transform_indices = @transform_3, window_bounds = array<i64: 2, 5>}]} {
    %c0_i32 = arith.constant 0 : i32
    %0 = arith.cmpi eq, %arg1, %c0_i32 : i32
    %1 = arith.extui %0 : i1 to i32
    %c0_i32_0 = arith.constant 0 : i32
    %2 = arith.cmpi ne, %1, %c0_i32_0 : i32
    scf.if %2 {
      %cst_8 = arith.constant 0.000000e+00 : f32
      %12 = vector.broadcast %cst_8 : f32 to vector<2x2048xf32>
      %c0_9 = arith.constant 0 : index
      %c0_10 = arith.constant 0 : index
      %13 = vector.load %arg6[%c0_9, %c0_10] : memref<2x2048xf32, #tpu.memory_space<vmem>>, vector<2x2048xf32>
      tpu.vector_store %arg6[%c0_9, %c0_10], %12 {strides = array<i32>} : memref<2x2048xf32, #tpu.memory_space<vmem>>, vector<2x2048xf32>,
    } else {
    }
    %c0 = arith.constant 0 : index
    %c0_1 = arith.constant 0 : index
    %3 = vector.load %arg6[%c0, %c0_1] : memref<2x2048xf32, #tpu.memory_space<vmem>>, vector<2x2048xf32>
    %c0_2 = arith.constant 0 : index
    %c0_3 = arith.constant 0 : index
    %c0_4 = arith.constant 0 : index
    %4 = vector.load %arg2[%c0_2, %c0_3, %c0_4] : memref<2x16x2048xbf16, #tpu.memory_space<vmem>>, vector<2x16x2048xbf16>
    %5 = arith.extf %4 : vector<2x16x2048xbf16> to vector<2x16x2048xf32>
    %cst = arith.constant dense<0.000000e+00> : vector<2x2048xf32>
    %6 = vector.multi_reduction <add>, %5, %cst [1] : vector<2x16x2048xf32> to vector<2x2048xf32>
    %7 = arith.addf %3, %6 : vector<2x2048xf32>
    %c0_5 = arith.constant 0 : index
    %c0_6 = arith.constant 0 : index
    %8 = vector.load %arg6[%c0_5, %c0_6] : memref<2x2048xf32, #tpu.memory_space<vmem>>, vector<2x2048xf32>
    tpu.vector_store %arg6[%c0_5, %c0_6], %7 {strides = array<i32>} : memref<2x2048xf32, #tpu.memory_space<vmem>>, vector<2x2048xf32>,
    %c3_i32 = arith.constant 3 : i32
    %9 = arith.cmpi eq, %arg1, %c3_i32 : i32
    %10 = arith.extui %9 : i1 to i32
    %c0_i32_7 = arith.constant 0 : i32
    %11 = arith.cmpi ne, %10, %c0_i32_7 : i32
    scf.if %11 {
      %c0_8 = arith.constant 0 : index
      %c0_9 = arith.constant 0 : index
      %12 = vector.load %arg6[%c0_8, %c0_9] : memref<2x2048xf32, #tpu.memory_space<vmem>>, vector<2x2048xf32>
      %c0_10 = arith.constant 0 : index
      %c0_11 = arith.constant 0 : index
      %13 = vector.load %arg3[%c0_10, %c0_11] : memref<2048x5xf32, #tpu.memory_space<vmem>>, vector<2048x5xf32>
      %cst_12 = arith.constant dense<0.000000e+00> : vector<2x5xf32>
      %14 = tpu.matmul %12, %13, %cst_12 {dimension_numbers = #tpu.dot_dimension_numbers<[1], [0], [0], [1], [0, 0, 1, 1], [], []>} : vector<2x2048xf32>, vector<2048x5xf32>, vector<2x5xf32> -> vector<2x5xf32>
      %c0_13 = arith.constant 0 : index
      %c0_14 = arith.constant 0 : index
      %15 = vector.load %arg4[%c0_13, %c0_14] : memref<1x5xf32, #tpu.memory_space<vmem>>, vector<1x5xf32>
      %16 = vector.broadcast %15 : vector<1x5xf32> to vector<2x5xf32>
      %17 = arith.addf %14, %16 : vector<2x5xf32>
      %c0_15 = arith.constant 0 : index
      %c0_16 = arith.constant 0 : index
      %18 = vector.load %arg5[%c0_15, %c0_16] : memref<2x5xf32, #tpu.memory_space<vmem>>, vector<2x5xf32>
      tpu.vector_store %arg5[%c0_15, %c0_16], %17 {strides = array<i32>} : memref<2x5xf32, #tpu.memory_space<vmem>>, vector<2x5xf32>,
    } else {
    }
    return
  }
  func.func @transform_0(%arg0: i32, %arg1: i32) -> (i32, i32, i32) {
    %c0_i32 = arith.constant 0 : i32
    %c0_i32_0 = arith.constant 0 : i32
    return %arg0, %arg1, %c0_i32 : i32, i32, i32
  }
  func.func @transform_1(%arg0: i32, %arg1: i32) -> (i32, i32) {
    %c0_i32 = arith.constant 0 : i32
    %c0_i32_0 = arith.constant 0 : i32
    %c0_i32_1 = arith.constant 0 : i32
    return %c0_i32, %c0_i32_0 : i32, i32
  }
  func.func @transform_2(%arg0: i32, %arg1: i32) -> (i32, i32) {
    %c0_i32 = arith.constant 0 : i32
    %c0_i32_0 = arith.constant 0 : i32
    %c0_i32_1 = arith.constant 0 : i32
    return %c0_i32, %c0_i32_0 : i32, i32
  }
  func.func @transform_3(%arg0: i32, %arg1: i32) -> (i32, i32) {
    %c0_i32 = arith.constant 0 : i32
    %c0_i32_0 = arith.constant 0 : i32
    return %arg0, %c0_i32 : i32, i32
  }
}

</mosaic_0001>

<bundles_post_ra>
// kernel: tpu_custom_call.1
= control target key start
LH: loop header
LB: loop body
LE: loop exit
PB: predicated region body
PF: predicated region fallthrough
CT: control target
= control target key end

     0   :  { %8 = vsyncpa [#allocation5], 0  ;;  %s2499_s12 = smov 0   ;;  %s2501_s13 = smov 0   ;;  %s3888_s0 = inlined_call_operand.vmem [shape: bf16[2,64,2048], index: 0, kind: input, shape index: {}]   ;;  %s3889_s1 = inlined_call_operand.vmem [shape: f32[2048,5], index: 1, kind: input, shape index: {}]   ;;  %s3890_s2 = inlined_call_operand.vmem [shape: f32[1,5], index: 2, kind: input, shape index: {}]   ;;  %s3891_s3 = inlined_call_operand.hbm [shape: f32[2,5], index: 3, kind: output, shape index: {}]  }
   0x1   :  { %s2503_s14 = smov 0   ;;  %s2505_s15 = smov 0  }
   0x2   :  { %s2507_s16 = smov 0  }
   0x3 LB: > { %s1799_s17 = sadd.s32 4294967295, %s2474_s16   ;;  %s23_s18 = sadd.s32 1, %s2470_s15  ;;  %s2474_s16 = sphi %s2507_s16, %s14_s16   ;;  %s2470_s15 = sphi %s2505_s15, %s3939_s15   ;;  %s2466_s14 = sphi %s2503_s14, %s3938_s14   ;;  %s2462_s13 = sphi %s2501_s13, %s3937_s13   ;;  %s2458_s12 = sphi %s2499_s12, %s3936_s12  }
   0x4   : > { %p24_p0 = scmp.ge.s32.totalorder %s23_s18, 4  ;;  %p42_p1 = scmp.ne.s32.totalorder %s2462_s13, %s2458_s12 }
   0x5   : > { %p43_p2 = scmp.eq.s32.totalorder %s2474_s16, 0  ;;  %s35_s20 = sadd.s32 1, %s2462_s13 }
   0x6   : > { %s3941_s18 = smov (%p24_p0, %s23_s18), 0  ;;  %p1801_p5 = scmp.ge.s32.totalorder %s2474_s16, 4 }
   0x7   : > { %p44_p3 = por %p43_p2, %p42_p1  ;;  %s31_s19 = ssub.s32 %s2470_s15, %s3941_s18 }
   0x8   : > { %p33_p4 = scmp.eq.s32.totalorder %s31_s19, 0  ;;  %142 = sbr.rel (%p1801_p5) target bundleno = 35 (0x23), region = 24 }
   0xa   : > { %s2535_s21 = scalar_select %p33_p4, %s2462_s13, %s35_s20  }
   0xf   : > { %145 = sbr.rel (!%p44_p3) target bundleno = 35 (0x23), region = 28  ;;  %s147_s22 = sand.u32 (%p44_p3), 1, %s2462_s13  }
  0x10   : > { %s1816_s23 = sshll.u32 (%p44_p3), %s2470_s15, 7  ;;  %s1802_s24 = sshll.u32 (%p44_p3), %s147_s22, 8 }
  0x11   : > { %s2543_s27 = scalar_lea.vmem (%p44_p3), %s3888_s0, %s1816_s23  ;;  %s2548_s28 = scalar_lea.vmem (%p44_p3), [#allocation3], %s1802_s24 }
  0x12   : > { %v169_v0 = vld [vmem:[%s2543_s27] sm:$0xff] (%p44_p3)  ;;  %v171_v1 = vld [vmem:[%s2543_s27 + $0x8] sm:$0xff] (%p44_p3)  ;;  %v173_v2 = vld [vmem:[%s2543_s27 + $0x10] sm:$0xff] (%p44_p3) }
  0x13   : > { %170 = vst [vmem:[%s2548_s28] sm:$0xff] (%p44_p3), %v169_v0  ;;  %172 = vst [vmem:[%s2548_s28 + $0x8] sm:$0xff] (%p44_p3), %v171_v1  ;;  %v175_v3 = vld [vmem:[%s2543_s27 + $0x18] sm:$0xff] (%p44_p3)  ;;  %v177_v4 = vld [vmem:[%s2543_s27 + $0x20] sm:$0xff] (%p44_p3) }
  0x14   : > { %174 = vst [vmem:[%s2548_s28 + $0x10] sm:$0xff] (%p44_p3), %v173_v2  ;;  %v179_v5 = vld [vmem:[%s2543_s27 + $0x28] sm:$0xff] (%p44_p3)  ;;  %176 = vst [vmem:[%s2548_s28 + $0x18] sm:$0xff] (%p44_p3), %v175_v3  ;;  %v181_v6 = vld [vmem:[%s2543_s27 + $0x30] sm:$0xff] (%p44_p3) }
  0x15   : > { %178 = vst [vmem:[%s2548_s28 + $0x20] sm:$0xff] (%p44_p3), %v177_v4  ;;  %180 = vst [vmem:[%s2548_s28 + $0x28] sm:$0xff] (%p44_p3), %v179_v5  ;;  %v183_v7 = vld [vmem:[%s2543_s27 + $0x38] sm:$0xff] (%p44_p3)  ;;  %v185_v8 = vld [vmem:[%s2543_s27 + $0x40] sm:$0xff] (%p44_p3) }
  0x16   : > { %182 = vst [vmem:[%s2548_s28 + $0x30] sm:$0xff] %v181_v6  ;;  %184 = vst [vmem:[%s2548_s28 + $0x38] sm:$0xff] %v183_v7  ;;  %v187_v9 = vld [vmem:[%s2543_s27 + $0x48] sm:$0xff]  ;;  %v189_v10 = vld [vmem:[%s2543_s27 + $0x50] sm:$0xff] }
  0x17   : > { %186 = vst [vmem:[%s2548_s28 + $0x40] sm:$0xff] %v185_v8  ;;  %v191_v11 = vld [vmem:[%s2543_s27 + $0x58] sm:$0xff]  ;;  %188 = vst [vmem:[%s2548_s28 + $0x48] sm:$0xff] %v187_v9  ;;  %v193_v12 = vld [vmem:[%s2543_s27 + $0x60] sm:$0xff] }
  0x18   : > { %190 = vst [vmem:[%s2548_s28 + $0x50] sm:$0xff] %v189_v10  ;;  %192 = vst [vmem:[%s2548_s28 + $0x58] sm:$0xff] %v191_v11  ;;  %v195_v13 = vld [vmem:[%s2543_s27 + $0x68] sm:$0xff]  ;;  %v197_v14 = vld [vmem:[%s2543_s27 + $0x70] sm:$0xff] }
  0x19   : > { %194 = vst [vmem:[%s2548_s28 + $0x60] sm:$0xff] %v193_v12  ;;  %196 = vst [vmem:[%s2548_s28 + $0x68] sm:$0xff] %v195_v13  ;;  %v199_v15 = vld [vmem:[%s2543_s27 + $0x78] sm:$0xff]  ;;  %v201_v16 = vld [vmem:[%s2543_s27 + $0x200] sm:$0xff] }
  0x1a   : > { %198 = vst [vmem:[%s2548_s28 + $0x70] sm:$0xff] %v197_v14  ;;  %v203_v17 = vld [vmem:[%s2543_s27 + $0x208] sm:$0xff]  ;;  %200 = vst [vmem:[%s2548_s28 + $0x78] sm:$0xff] %v199_v15  ;;  %v205_v18 = vld [vmem:[%s2543_s27 + $0x210] sm:$0xff] }
  0x1b   : > { %202 = vst [vmem:[%s2548_s28 + $0x80] sm:$0xff] %v201_v16  ;;  %204 = vst [vmem:[%s2548_s28 + $0x88] sm:$0xff] %v203_v17  ;;  %v207_v19 = vld [vmem:[%s2543_s27 + $0x218] sm:$0xff]  ;;  %v209_v20 = vld [vmem:[%s2543_s27 + $0x220] sm:$0xff] }
  0x1c   : > { %206 = vst [vmem:[%s2548_s28 + $0x90] sm:$0xff] %v205_v18  ;;  %208 = vst [vmem:[%s2548_s28 + $0x98] sm:$0xff] %v207_v19  ;;  %v211_v21 = vld [vmem:[%s2543_s27 + $0x228] sm:$0xff]  ;;  %v213_v22 = vld [vmem:[%s2543_s27 + $0x230] sm:$0xff] }
  0x1d   : > { %210 = vst [vmem:[%s2548_s28 + $0xa0] sm:$0xff] %v209_v20  ;;  %v215_v23 = vld [vmem:[%s2543_s27 + $0x238] sm:$0xff]  ;;  %212 = vst [vmem:[%s2548_s28 + $0xa8] sm:$0xff] %v211_v21  ;;  %v217_v24 = vld [vmem:[%s2543_s27 + $0x240] sm:$0xff] }
  0x1e   : > { %214 = vst [vmem:[%s2548_s28 + $0xb0] sm:$0xff] %v213_v22  ;;  %216 = vst [vmem:[%s2548_s28 + $0xb8] sm:$0xff] %v215_v23  ;;  %v219_v25 = vld [vmem:[%s2543_s27 + $0x248] sm:$0xff]  ;;  %v221_v26 = vld [vmem:[%s2543_s27 + $0x250] sm:$0xff] }
  0x1f   : > { %218 = vst [vmem:[%s2548_s28 + $0xc0] sm:$0xff] %v217_v24  ;;  %220 = vst [vmem:[%s2548_s28 + $0xc8] sm:$0xff] %v219_v25  ;;  %v223_v27 = vld [vmem:[%s2543_s27 + $0x258] sm:$0xff]  ;;  %v225_v28 = vld [vmem:[%s2543_s27 + $0x260] sm:$0xff] }
  0x20   : > { %222 = vst [vmem:[%s2548_s28 + $0xd0] sm:$0xff] %v221_v26  ;;  %v227_v29 = vld [vmem:[%s2543_s27 + $0x268] sm:$0xff]  ;;  %224 = vst [vmem:[%s2548_s28 + $0xd8] sm:$0xff] %v223_v27  ;;  %v229_v30 = vld [vmem:[%s2543_s27 + $0x270] sm:$0xff] }
  0x21   : > { %226 = vst [vmem:[%s2548_s28 + $0xe0] sm:$0xff] %v225_v28  ;;  %228 = vst [vmem:[%s2548_s28 + $0xe8] sm:$0xff] %v227_v29  ;;  %v231_v31 = vld [vmem:[%s2543_s27 + $0x278] sm:$0xff] }
  0x22   : > { %230 = vst [vmem:[%s2548_s28 + $0xf0] sm:$0xff] %v229_v30  ;;  %232 = vst [vmem:[%s2548_s28 + $0xf8] sm:$0xff] %v231_v31 }
  0x23 PF: > { %p1806_p6 = scmp.ge.s32.totalorder %s2474_s16, 1  ;;  %p237_p7 = scmp.lt.s32.totalorder %s2474_s16, 5 }
  0x25   : > { %p238_p8 = pnand %p1806_p6, %p237_p7 }
  0x27   : > { %241 = sbr.rel (%p238_p8) target bundleno = 515 (0x203), region = 51 }
  0x2e   : > { %s244_s29 = sand.u32 1, %s2458_s12   ;;  %p1808_p9 = scmp.ne.s32.totalorder %s2466_s14, 0 }
  0x2f   : > { %s1807_s30 = sshll.u32 %s244_s29, 8  ;;  %v2476_v32 = vmov (!%p1808_p9), 0.0  }
  0x30   : > { %s2614_s4 = scalar_lea.vmem [#allocation3], %s1807_s30  ;;  %267 = sbr.rel (%p1808_p9) target bundleno = 55 (0x37), region = 59  ;;  %268 = vst [vmem:[#allocation2] sm:$0xff] (!%p1808_p9), %v2476_v32  ;;  %269 = vst [vmem:[#allocation2 + $0x8] sm:$0xff] (!%p1808_p9), %v2476_v32 }
  0x31   : > { %270 = vst [vmem:[#allocation2 + $0x10] sm:$0xff] (!%p1808_p9), %v2476_v32  ;;  %271 = vst [vmem:[#allocation2 + $0x18] sm:$0xff] (!%p1808_p9), %v2476_v32 }
  0x37 PF: > { %v2618_v33 = vld [vmem:[%s2614_s4] sm:$0xff]  ;;  %v2621_v34 = vld [vmem:[%s2614_s4 + $0x8] sm:$0xff]  ;;  %v2624_v35 = vld [vmem:[%s2614_s4 + $0x10] sm:$0xff]  ;;  %v2477_v38 = vmov 1983009808   ;;  %vm769_vm0 = vcmask 1041409  }
  0x38   : > { %v2627_v36 = vld [vmem:[%s2614_s4 + $0x18] sm:$0xff]  ;;  %v2630_v37 = vld [vmem:[%s2614_s4 + $0x20] sm:$0xff]  ;;  %v2632_v39 = vunpack.c.l.s4 %v2477_v38  ;;  %v2635_v41 = vld [vmem:[%s2614_s4 + $0x28] sm:$0xff]  ;;  %v308_v44 = vunpack.c.l.bf16 %v2618_v33  ;;  %v309_v45 = vunpack.c.h.bf16 %v2618_v33  ;;  %v310_v46 = vunpack.c.l.bf16 %v2621_v34  ;;  %p1809_p10 = scmp.ne.s32.totalorder %s2466_s14, 3 }
  0x39   : > { %v2638_v42 = vld [vmem:[%s2614_s4 + $0x30] sm:$0xff]  ;;  %v2641_v43 = vld [vmem:[%s2614_s4 + $0x38] sm:$0xff]  ;;  %v311_v47 = vunpack.c.h.bf16 %v2621_v34  ;;  %v2648_v48 = vld [vmem:[%s2614_s4 + $0x40] sm:$0xff]  ;;  %v312_v50 = vunpack.c.l.bf16 %v2624_v35  ;;  %v313_v51 = vunpack.c.h.bf16 %v2624_v35  ;;  %v314_v52 = vunpack.c.l.bf16 %v2627_v36 }
  0x3a   : > { %3892 = vst [vmem:[#allocation7_spill] sm:$0xff] %v2632_v39  ;;  %v2651_v49 = vld [vmem:[%s2614_s4 + $0x48] sm:$0xff]  ;;  %v315_v53 = vunpack.c.h.bf16 %v2627_v36  ;;  %v2658_v54 = vld [vmem:[%s2614_s4 + $0x50] sm:$0xff]  ;;  %v2661_v55 = vld [vmem:[%s2614_s4 + $0x58] sm:$0xff]  ;;  %v316_v56 = vunpack.c.l.bf16 %v2630_v37  ;;  %v317_v57 = vunpack.c.h.bf16 %v2630_v37  ;;  %v318_v58 = vunpack.c.l.bf16 %v2635_v41 }
  0x3b   : > { %v319_v59 = vunpack.c.h.bf16 %v2635_v41  ;;  %v2668_v60 = vld [vmem:[%s2614_s4 + $0x60] sm:$0xff]  ;;  %v2671_v61 = vld [vmem:[%s2614_s4 + $0x68] sm:$0xff]  ;;  %v2678_v2 = vld [vmem:[%s2614_s4 + $0x70] sm:$0xff]  ;;  %v324_v4 = vunpack.c.l.bf16 %v2648_v48  ;;  %v325_v5 = vunpack.c.h.bf16 %v2648_v48  ;;  %v326_v6 = vunpack.c.l.bf16 %v2651_v49 }
  0x3c   : > { %v2681_v3 = vld [vmem:[%s2614_s4 + $0x78] sm:$0xff]  ;;  %v327_v7 = vunpack.c.h.bf16 %v2651_v49  ;;  %v2688_v8 = vld [vmem:[%s2614_s4 + $0x80] sm:$0xff]  ;;  %v2691_v9 = vld [vmem:[%s2614_s4 + $0x88] sm:$0xff]  ;;  %v328_v10 = vunpack.c.l.bf16 %v2658_v54  ;;  %v329_v11 = vunpack.c.h.bf16 %v2658_v54  ;;  %v330_v12 = vunpack.c.l.bf16 %v2661_v55 }
  0x3d   : > { %v331_v13 = vunpack.c.h.bf16 %v2661_v55  ;;  %v2698_v14 = vld [vmem:[%s2614_s4 + $0x90] sm:$0xff]  ;;  %v2701_v15 = vld [vmem:[%s2614_s4 + $0x98] sm:$0xff]  ;;  %v332_v16 = vunpack.c.l.bf16 %v2668_v60  ;;  %v333_v17 = vunpack.c.h.bf16 %v2668_v60  ;;  %v334_v18 = vunpack.c.l.bf16 %v2671_v61  ;;  %v2708_v20 = vld [vmem:[%s2614_s4 + $0xa0] sm:$0xff] }
  0x3e   : > { %v335_v19 = vunpack.c.h.bf16 %v2671_v61  ;;  %v2711_v21 = vld [vmem:[%s2614_s4 + $0xa8] sm:$0xff]  ;;  %v2718_v26 = vld [vmem:[%s2614_s4 + $0xb0] sm:$0xff]  ;;  %v2721_v27 = vld [vmem:[%s2614_s4 + $0xb8] sm:$0xff]  ;;  %v372_v28 = vadd.f32 %v324_v4, %v308_v44  ;;  %v379_v0 = vadd.f32 %v325_v5, %v309_v45  ;;  %v386_v23 = vadd.f32 %v326_v6, %v310_v46 }
  0x3f   : > { %v2728_v32 = vld [vmem:[%s2614_s4 + $0xc0] sm:$0xff]  ;;  %v2731_v38 = vld [vmem:[%s2614_s4 + $0xc8] sm:$0xff]  ;;  %v2738_v40 = vld [vmem:[%s2614_s4 + $0xd0] sm:$0xff]  ;;  %v393_v55 = vadd.f32 %v327_v7, %v311_v47  ;;  %v400_v49 = vadd.f32 %v328_v10, %v312_v50  ;;  %v407_v30 = vadd.f32 %v329_v11, %v313_v51  ;;  %v414_v31 = vadd.f32 %v330_v12, %v314_v52 }
  0x40   : > { %v2741_v29 = vld [vmem:[%s2614_s4 + $0xd8] sm:$0xff]  ;;  %v2748_v1 = vld [vmem:[%s2614_s4 + $0xe0] sm:$0xff]  ;;  %v2751_v48 = vld [vmem:[%s2614_s4 + $0xe8] sm:$0xff]  ;;  %v421_v44 = vadd.f32 %v331_v13, %v315_v53  ;;  %v373_v33 = vrot.slane %v372_v28, 4  ;;  %v380_v45 = vrot.slane %v379_v0, 4  ;;  %v387_v4 = vrot.slane %v386_v23, 4 }
  0x41   : > { %v394_v5 = vrot.slane %v393_v55, 4  ;;  %v401_v46 = vrot.slane %v400_v49, 4  ;;  %v408_v6 = vrot.slane %v407_v30, 4  ;;  %v415_v34 = vrot.slane %v414_v31, 4  ;;  %v2786_v62 = vld [vmem:[%s2614_s4 + $0xf0] sm:$0xff] }
  0x42   : > { %v422_v47 = vrot.slane %v421_v44, 4  ;;  %v374_v7 = vadd.f32 %v373_v33, %v372_v28  ;;  %v381_v50 = vadd.f32 %v380_v45, %v379_v0  ;;  %v388_v35 = vadd.f32 %v387_v4, %v386_v23  ;;  %v2789_v28 = vld [vmem:[%s2614_s4 + $0xf8] sm:$0xff] }
  0x43   : > { %v395_v51 = vadd.f32 %v394_v5, %v393_v55  ;;  %v402_v10 = vadd.f32 %v401_v46, %v400_v49  ;;  %v409_v11 = vadd.f32 %v408_v6, %v407_v30  ;;  %v416_v52 = vadd.f32 %v415_v34, %v414_v31 }
  0x44   : > { %v423_v12 = vadd.f32 %v422_v47, %v421_v44  ;;  %v375_v36 = vrot.slane %v374_v7, 2  ;;  %v382_v53 = vrot.slane %v381_v50, 2  ;;  %v389_v13 = vrot.slane %v388_v35, 2 }
  0x45   : > { %v396_v24 = vrot.slane %v395_v51, 2  ;;  %v403_v54 = vrot.slane %v402_v10, 2  ;;  %v410_v25 = vrot.slane %v409_v11, 2  ;;  %v417_v63 = vrot.slane %v416_v52, 2 }
  0x46   : > { %v424_v22 = vrot.slane %v423_v12, 2  ;;  %v376_v0 = vadd.f32 %v375_v36, %v374_v7  ;;  %v383_v33 = vadd.f32 %v382_v53, %v381_v50  ;;  %v390_v23 = vadd.f32 %v389_v13, %v388_v35 }
  0x47   : > { %v397_v55 = vadd.f32 %v396_v24, %v395_v51  ;;  %v2791_v49 = vadd.f32 %v403_v54, %v402_v10  ;;  %v2793_v30 = vadd.f32 %v410_v25, %v409_v11  ;;  %v2795_v31 = vadd.f32 %v417_v63, %v416_v52 }
  0x48   : > { %v2797_v44 = vadd.f32 %v424_v22, %v423_v12  ;;  %v377_v45 = vrot.slane %v376_v0, 1  ;;  %v384_v4 = vrot.slane %v383_v33, 1  ;;  %v391_v5 = vrot.slane %v390_v23, 1 }
  0x49   : > { %v398_v46 = vrot.slane %v397_v55, 1  ;;  %v405_v54 = vrot.slane %v2791_v49, 1  ;;  %v412_v25 = vrot.slane %v2793_v30, 1  ;;  %v419_v63 = vrot.slane %v2795_v31, 1 }
  0x4a   : > { %v426_v22 = vrot.slane %v2797_v44, 1  ;;  %v2807_v7 = vadd.f32 %v377_v45, %v376_v0  ;;  %v2809_v50 = vadd.f32 %v384_v4, %v383_v33  ;;  %v2811_v35 = vadd.f32 %v391_v5, %v390_v23 }
  0x4b   : > { %v2813_v51 = vadd.f32 %v398_v46, %v397_v55  ;;  %v428_v10 = vadd.f32 %v332_v16, %v316_v56  ;;  %v435_v11 = vadd.f32 %v333_v17, %v317_v57  ;;  %v442_v52 = vadd.f32 %v334_v18, %v318_v58 }
  0x4c   : > { %v449_v12 = vadd.f32 %v335_v19, %v319_v59  ;;  %v3893_v36 = vunpack.c.l.bf16 %v2638_v42  ;;  %v3894_v53 = vunpack.c.l.bf16 %v2678_v2  ;;  %v3895_v37 = vunpack.c.h.bf16 %v2638_v42 }
  0x4d   : > { %v3896_v60 = vunpack.c.h.bf16 %v2678_v2  ;;  %v3897_v16 = vunpack.c.l.bf16 %v2641_v43  ;;  %v3898_v17 = vunpack.c.l.bf16 %v2681_v3  ;;  %v3899_v41 = vunpack.c.h.bf16 %v2641_v43 }
  0x4e   : > { %v456_v56 = vadd.f32 %v3894_v53, %v3893_v36  ;;  %v3900_v61 = vunpack.c.h.bf16 %v2681_v3  ;;  %v429_v18 = vrot.slane %v428_v10, 4  ;;  %v436_v19 = vrot.slane %v435_v11, 4 }
  0x4f   : > { %v463_v57 = vadd.f32 %v3896_v60, %v3895_v37  ;;  %v470_v58 = vadd.f32 %v3898_v17, %v3897_v16  ;;  %v443_v13 = vrot.slane %v442_v52, 4  ;;  %v450_v0 = vrot.slane %v449_v12, 4 }
  0x50   : > { %v477_v59 = vadd.f32 %v3900_v61, %v3899_v41  ;;  %v457_v33 = vrot.slane %v456_v56, 4  ;;  %v430_v2 = vadd.f32 %v429_v18, %v428_v10  ;;  %v437_v45 = vadd.f32 %v436_v19, %v435_v11 }
  0x51   : > { %v464_v23 = vrot.slane %v463_v57, 4  ;;  %v471_v42 = vrot.slane %v470_v58, 4  ;;  %v444_v4 = vadd.f32 %v443_v13, %v442_v52  ;;  %v451_v5 = vadd.f32 %v450_v0, %v449_v12 }
  0x52   : > { %v478_v55 = vrot.slane %v477_v59, 4  ;;  %v458_v46 = vadd.f32 %v457_v33, %v456_v56  ;;  %v431_v43 = vrot.slane %v430_v2, 2  ;;  %v438_v60 = vrot.slane %v437_v45, 2 }
  0x53   : > { %v465_v36 = vadd.f32 %v464_v23, %v463_v57  ;;  %v472_v53 = vadd.f32 %v471_v42, %v470_v58  ;;  %v445_v3 = vrot.slane %v444_v4, 2  ;;  %v452_v16 = vrot.slane %v451_v5, 2 }
  0x54   : > { %v479_v37 = vadd.f32 %v478_v55, %v477_v59  ;;  %v459_v17 = vrot.slane %v458_v46, 2  ;;  %v432_v47 = vadd.f32 %v431_v43, %v430_v2  ;;  %v439_v34 = vadd.f32 %v438_v60, %v437_v45 }
  0x55   : > { %v466_v41 = vrot.slane %v465_v36, 2  ;;  %v473_v61 = vrot.slane %v472_v53, 2  ;;  %v446_v6 = vadd.f32 %v445_v3, %v444_v4  ;;  %v453_v39 = vadd.f32 %v452_v16, %v451_v5 }
  0x56   : > { %v480_v24 = vrot.slane %v479_v37, 2  ;;  %v2847_v10 = vadd.f32 %v459_v17, %v458_v46  ;;  %v433_v56 = vrot.slane %v432_v47, 1  ;;  %v440_v57 = vrot.slane %v439_v34, 1 }
  0x57   : > { %v2849_v11 = vadd.f32 %v466_v41, %v465_v36  ;;  %v2851_v52 = vadd.f32 %v473_v61, %v472_v53  ;;  %v447_v58 = vrot.slane %v446_v6, 1  ;;  %v454_v59 = vrot.slane %v453_v39, 1 }
  0x58   : > { %v2853_v12 = vadd.f32 %v480_v24, %v479_v37  ;;  %v2856_v18 = vadd.f32 %v405_v54, %v2791_v49  ;;  %v2859_v19 = vadd.f32 %v412_v25, %v2793_v30  ;;  %v2862_v13 = vadd.f32 %v419_v63, %v2795_v31 }
  0x59   : > { %v2865_v0 = vadd.f32 %v426_v22, %v2797_v44  ;;  %v461_v33 = vrot.slane %v2847_v10, 1  ;;  %v468_v24 = vrot.slane %v2849_v11, 1  ;;  %v475_v23 = vrot.slane %v2851_v52, 1 }
  0x5a   : > { %v482_v42 = vrot.slane %v2853_v12, 1  ;;  %v2871_v55 = vadd.f32 %v433_v56, %v432_v47  ;;  %v2873_v49 = vadd.f32 %v440_v57, %v439_v34  ;;  %v2875_v30 = vadd.f32 %v447_v58, %v446_v6 }
  0x5b   : > { %v2877_v54 = vadd.f32 %v454_v59, %v453_v39  ;;  %v3901_v31 = vunpack.c.l.bf16 %v2688_v8  ;;  %v3902_v44 = vunpack.c.l.bf16 %v2728_v32  ;;  %v3903_v63 = vunpack.c.h.bf16 %v2688_v8 }
  0x5c   : > { %v3904_v22 = vunpack.c.h.bf16 %v2728_v32  ;;  %v3905_v45 = vunpack.c.l.bf16 %v2691_v9  ;;  %v3906_v47 = vunpack.c.l.bf16 %v2731_v38  ;;  %v3907_v6 = vunpack.c.h.bf16 %v2691_v9 }
  0x5d   : > { %v484_v25 = vadd.f32 %v3902_v44, %v3901_v31  ;;  %v3908_v39 = vunpack.c.h.bf16 %v2731_v38  ;;  %v3909_v5 = vunpack.c.l.bf16 %v2698_v14  ;;  %v3910_v46 = vunpack.c.l.bf16 %v2738_v40 }
  0x5e   : > { %v491_v2 = vadd.f32 %v3904_v22, %v3903_v63  ;;  %v498_v34 = vadd.f32 %v3906_v47, %v3905_v45  ;;  %v3911_v8 = vunpack.c.h.bf16 %v2698_v14  ;;  %v3912_v32 = vunpack.c.h.bf16 %v2738_v40 }
  0x5f   : > { %v505_v4 = vadd.f32 %v3908_v39, %v3907_v6  ;;  %v512_v36 = vadd.f32 %v3910_v46, %v3909_v5  ;;  %v3913_v37 = vunpack.c.l.bf16 %v2701_v15  ;;  %v3914_v43 = vunpack.c.l.bf16 %v2741_v29 }
  0x60   : > { %v519_v53 = vadd.f32 %v3912_v32, %v3911_v8  ;;  %v3915_v9 = vunpack.c.h.bf16 %v2701_v15  ;;  %v3916_v38 = vunpack.c.h.bf16 %v2741_v29  ;;  %v485_v16 = vrot.slane %v484_v25, 4 }
  0x61   : > { %v526_v60 = vadd.f32 %v3914_v43, %v3913_v37  ;;  %v492_v17 = vrot.slane %v491_v2, 4  ;;  %v499_v41 = vrot.slane %v498_v34, 4  ;;  %v506_v61 = vrot.slane %v505_v4, 4 }
  0x62   : > { %v533_v3 = vadd.f32 %v3916_v38, %v3915_v9  ;;  %v513_v56 = vrot.slane %v512_v36, 4  ;;  %v520_v57 = vrot.slane %v519_v53, 4  ;;  %v486_v40 = vadd.f32 %v485_v16, %v484_v25 }
  0x63   : > { %v527_v14 = vrot.slane %v526_v60, 4  ;;  %v493_v59 = vadd.f32 %v492_v17, %v491_v2  ;;  %v500_v31 = vadd.f32 %v499_v41, %v498_v34  ;;  %v507_v44 = vadd.f32 %v506_v61, %v505_v4 }
  0x64   : > { %v534_v58 = vrot.slane %v533_v3, 4  ;;  %v514_v63 = vadd.f32 %v513_v56, %v512_v36  ;;  %v521_v22 = vadd.f32 %v520_v57, %v519_v53  ;;  %v487_v15 = vrot.slane %v486_v40, 2 }
  0x65   : > { %v528_v45 = vadd.f32 %v527_v14, %v526_v60  ;;  %v494_v6 = vrot.slane %v493_v59, 2  ;;  %v501_v29 = vrot.slane %v500_v31, 2  ;;  %v508_v39 = vrot.slane %v507_v44, 2 }
  0x66   : > { %v535_v47 = vadd.f32 %v534_v58, %v533_v3  ;;  %v515_v5 = vrot.slane %v514_v63, 2  ;;  %v522_v46 = vrot.slane %v521_v22, 2  ;;  %v488_v37 = vadd.f32 %v487_v15, %v486_v40 }
  0x67   : > { %v529_v8 = vrot.slane %v528_v45, 2  ;;  %v495_v43 = vadd.f32 %v494_v6, %v493_v59  ;;  %v502_v9 = vadd.f32 %v501_v29, %v500_v31  ;;  %v509_v38 = vadd.f32 %v508_v39, %v507_v44 }
  0x68   : > { %v536_v32 = vrot.slane %v535_v47, 2  ;;  %v2911_v25 = vadd.f32 %v515_v5, %v514_v63  ;;  %v2913_v2 = vadd.f32 %v522_v46, %v521_v22  ;;  %v489_v36 = vrot.slane %v488_v37, 1 }
  0x69   : > { %v2915_v34 = vadd.f32 %v529_v8, %v528_v45  ;;  %v496_v53 = vrot.slane %v495_v43, 1  ;;  %v503_v60 = vrot.slane %v502_v9, 1  ;;  %v510_v3 = vrot.slane %v509_v38, 1 }
  0x6a   : > { %v2917_v4 = vadd.f32 %v536_v32, %v535_v47  ;;  %v2920_v16 = vadd.f32 %v461_v33, %v2847_v10  ;;  %v2923_v17 = vadd.f32 %v468_v24, %v2849_v11  ;;  %v2926_v41 = vadd.f32 %v475_v23, %v2851_v52 }
  0x6b   : > { %v2929_v61 = vadd.f32 %v482_v42, %v2853_v12  ;;  %v517_v56 = vrot.slane %v2911_v25, 1  ;;  %v524_v57 = vrot.slane %v2913_v2, 1  ;;  %v531_v14 = vrot.slane %v2915_v34, 1 }
  0x6c   : > { %v538_v58 = vrot.slane %v2917_v4, 1  ;;  %v2935_v40 = vadd.f32 %v489_v36, %v488_v37  ;;  %v2937_v10 = vadd.f32 %v496_v53, %v495_v43  ;;  %v2939_v11 = vadd.f32 %v503_v60, %v502_v9 }
  0x6d   : > { %v2941_v33 = vadd.f32 %v510_v3, %v509_v38  ;;  %v3917_v52 = vunpack.c.l.bf16 %v2708_v20  ;;  %v3918_v12 = vunpack.c.l.bf16 %v2748_v1  ;;  %v3919_v23 = vunpack.c.h.bf16 %v2708_v20 }
  0x6e   : > { %v3920_v42 = vunpack.c.h.bf16 %v2748_v1  ;;  %v3921_v31 = vunpack.c.l.bf16 %v2711_v21  ;;  %v3922_v44 = vunpack.c.l.bf16 %v2751_v48  ;;  %v3923_v22 = vunpack.c.h.bf16 %v2711_v21 }
  0x6f   : > { %v540_v24 = vadd.f32 %v3918_v12, %v3917_v52  ;;  %v3924_v45 = vunpack.c.h.bf16 %v2751_v48  ;;  %v3925_v15 = vunpack.c.l.bf16 %v2718_v26  ;;  %v3926_v6 = vunpack.c.l.bf16 %v2786_v62 }
  0x70   : > { %v547_v59 = vadd.f32 %v3920_v42, %v3919_v23  ;;  %v554_v63 = vadd.f32 %v3922_v44, %v3921_v31  ;;  %v3927_v20 = vunpack.c.h.bf16 %v2718_v26  ;;  %v3928_v1 = vunpack.c.h.bf16 %v2786_v62 }
  0x71   : > { %v561_v47 = vadd.f32 %v3924_v45, %v3923_v22  ;;  %v568_v29 = vadd.f32 %v3926_v6, %v3925_v15  ;;  %v3929_v5 = vunpack.c.l.bf16 %v2721_v27  ;;  %v3930_v46 = vunpack.c.l.bf16 %v2789_v28 }
  0x72   : > { %v575_v39 = vadd.f32 %v3928_v1, %v3927_v20  ;;  %v3931_v21 = vunpack.c.h.bf16 %v2721_v27  ;;  %v3932_v48 = vunpack.c.h.bf16 %v2789_v28  ;;  %v541_v37 = vrot.slane %v540_v24, 4 }
  0x73   : > { %v582_v8 = vadd.f32 %v3930_v46, %v3929_v5  ;;  %v548_v43 = vrot.slane %v547_v59, 4  ;;  %v555_v9 = vrot.slane %v554_v63, 4  ;;  %v562_v38 = vrot.slane %v561_v47, 4 }
  0x74   : > { %v589_v32 = vadd.f32 %v3932_v48, %v3931_v21  ;;  %v569_v36 = vrot.slane %v568_v29, 4  ;;  %v576_v53 = vrot.slane %v575_v39, 4  ;;  %v542_v62 = vadd.f32 %v541_v37, %v540_v24 }
  0x75   : > { %v583_v26 = vrot.slane %v582_v8, 4  ;;  %v549_v3 = vadd.f32 %v548_v43, %v547_v59  ;;  %v556_v52 = vadd.f32 %v555_v9, %v554_v63  ;;  %v563_v12 = vadd.f32 %v562_v38, %v561_v47 }
  0x76   : > { %v590_v60 = vrot.slane %v589_v32, 4  ;;  %v570_v23 = vadd.f32 %v569_v36, %v568_v29  ;;  %v577_v42 = vadd.f32 %v576_v53, %v575_v39  ;;  %v543_v27 = vrot.slane %v542_v62, 2 }
  0x77   : > { %v584_v31 = vadd.f32 %v583_v26, %v582_v8  ;;  %v550_v22 = vrot.slane %v549_v3, 2  ;;  %v557_v28 = vrot.slane %v556_v52, 2  ;;  %v564_v45 = vrot.slane %v563_v12, 2 }
  0x78   : > { %v591_v44 = vadd.f32 %v590_v60, %v589_v32  ;;  %v571_v15 = vrot.slane %v570_v23, 2  ;;  %v578_v6 = vrot.slane %v577_v42, 2  ;;  %v544_v5 = vadd.f32 %v543_v27, %v542_v62 }
  0x79   : > { %v585_v20 = vrot.slane %v584_v31, 2  ;;  %v551_v46 = vadd.f32 %v550_v22, %v549_v3  ;;  %v558_v21 = vadd.f32 %v557_v28, %v556_v52  ;;  %v565_v48 = vadd.f32 %v564_v45, %v563_v12 }
  0x7a   : > { %v592_v1 = vrot.slane %v591_v44, 2  ;;  %v572_v24 = vadd.f32 %v571_v15, %v570_v23  ;;  %v579_v59 = vadd.f32 %v578_v6, %v577_v42  ;;  %v545_v29 = vrot.slane %v544_v5, 1 }
  0x7b   : > { %v586_v63 = vadd.f32 %v585_v20, %v584_v31  ;;  %v552_v39 = vrot.slane %v551_v46, 1  ;;  %v559_v8 = vrot.slane %v558_v21, 1  ;;  %v566_v32 = vrot.slane %v565_v48, 1 }
  0x7c   : > { %v593_v47 = vadd.f32 %v592_v1, %v591_v44  ;;  %v518_v37 = vadd.f32 %v517_v56, %v2911_v25  ;;  %v525_v43 = vadd.f32 %v524_v57, %v2913_v2  ;;  %v573_v9 = vrot.slane %v572_v24, 1  ;;  %v3933_v56 = vld [vmem:[#allocation7_spill] sm:$0xff] }
  0x7d   : > { %v580_v38 = vrot.slane %v579_v59, 1  ;;  %v532_v36 = vadd.f32 %v531_v14, %v2915_v34  ;;  %v539_v53 = vadd.f32 %v538_v58, %v2917_v4  ;;  %v587_v26 = vrot.slane %v586_v63, 1 }
  0x7e   : > { %v594_v60 = vrot.slane %v593_v47, 1  ;;  %v546_v62 = vadd.f32 %v545_v29, %v544_v5  ;;  %v553_v3 = vadd.f32 %v552_v39, %v551_v46  ;;  %v560_v52 = vadd.f32 %v559_v8, %v558_v21  ;;  %v272_v8 = vld [vmem:[#allocation2] sm:$0xff] }
  0x7f   : > { %v567_v12 = vadd.f32 %v566_v32, %v565_v48  ;;  %v628_v23 = vcombine.low %v2807_v7, %v2809_v50  ;;  %v629_v25 = vcombine.low %v2811_v35, %v2813_v51  ;;  %v632_v2 = vunpack.c.0.s8 %v3933_v56 }
  0x80   : > { %v3934_v57 = vlaneseq  ;;  %v574_v31 = vadd.f32 %v573_v9, %v572_v24  ;;  %v581_v34 = vadd.f32 %v580_v38, %v579_v59  ;;  %v645_v4 = vcombine.low %v2856_v18, %v2859_v19  ;;  %v273_v38 = vld [vmem:[#allocation2 + $0x8] sm:$0xff] }
  0x81   : > { %v646_v14 = vcombine.low %v2862_v13, %v2865_v0  ;;  %v662_v7 = vcombine.low %v2871_v55, %v2873_v49  ;;  %v663_v50 = vcombine.low %v2875_v30, %v2877_v54  ;;  %v696_v35 = vcombine.low %v2935_v40, %v2937_v10 }
  0x82   : > { %v634_v42 = vshrl.u32 %v3934_v57, 7  ;;  %v679_v51 = vcombine.low %v2920_v16, %v2923_v17  ;;  %v697_v18 = vcombine.low %v2939_v11, %v2941_v33  ;;  %v713_v19 = vcombine.low %v518_v37, %v525_v43 }
  0x83   : > { %v714_v13 = vcombine.low %v532_v36, %v539_v53  ;;  %v588_v0 = vadd.f32 %v587_v26, %v586_v63  ;;  %v730_v55 = vcombine.low %v546_v62, %v553_v3  ;;  %v595_v49 = vadd.f32 %v594_v60, %v593_v47 }
  0x84   : > { %v2989_v58 = vsub.s32 %v632_v2, %v634_v42  ;;  %v680_v40 = vcombine.low %v2926_v41, %v2929_v61  ;;  %v731_v6 = vcombine.low %v560_v52, %v567_v12  ;;  %v747_v41 = vcombine.low %v574_v31, %v581_v34  ;;  %v275_v42 = vld [vmem:[#allocation2 + $0x18] sm:$0xff] }
  0x85   : > { %v748_v46 = vcombine.low %v588_v0, %v595_v49  ;;  %vm771_vm1 = vcmask 1043459   ;;  %vm773_vm2 = vcmask 1045509   ;;  %vm775_vm3 = vcmask 1047559   ;;  %v819_v0 = vld [vmem:[%s3889_s1 + $0x8] sm:$0xff] (!%p1809_p10) }
  0x86   : > { %v636_v44 = vrot.slane %v628_v23, %v2989_v58  ;;  %v643_v27 = vrot.slane %v629_v25, %v2989_v58  ;;  %v653_v30 = vrot.slane %v645_v4, %v2989_v58  ;;  %v660_v54 = vrot.slane %v646_v14, %v2989_v58  ;;  %v274_v25 = vld [vmem:[#allocation2 + $0x10] sm:$0xff] }
  0x87   : > { %v670_v16 = vrot.slane %v662_v7, %v2989_v58  ;;  %v677_v17 = vrot.slane %v663_v50, %v2989_v58  ;;  %v704_v10 = vrot.slane %v696_v35, %v2989_v58  ;;  %v711_v11 = vrot.slane %v697_v18, %v2989_v58  ;;  %v835_v18 = vld [vmem:[%s3889_s1 + $0x88] sm:$0xff] (!%p1809_p10) }
  0x88   : > { %v644_v33 = vcombine.low %v636_v44, %v643_v27  ;;  %v687_v22 = vrot.slane %v679_v51, %v2989_v58  ;;  %v721_v28 = vrot.slane %v713_v19, %v2989_v58  ;;  %v728_v45 = vrot.slane %v714_v13, %v2989_v58  ;;  %v834_v51 = vld [vmem:[%s3889_s1 + $0x80] sm:$0xff] (!%p1809_p10)  ;;  %v867_v27 = vld [vmem:[%s3889_s1 + $0x188] sm:$0xff] (!%p1809_p10) }
  0x89   : > { %v712_v15 = vcombine.low %v704_v10, %v711_v11  ;;  %v738_v20 = vrot.slane %v730_v55, %v2989_v58  ;;  %v661_v61 = vcombine.low %v653_v30, %v660_v54  ;;  %v694_v1 = vrot.slane %v680_v40, %v2989_v58  ;;  %v818_v19 = vld [vmem:[%s3889_s1] sm:$0xff] (!%p1809_p10)  ;;  %v851_v54 = vld [vmem:[%s3889_s1 + $0x108] sm:$0xff] (!%p1809_p10)  ;;  %v836_v40 = vld [vmem:[%s3889_s1 + $0x90] sm:$0xff] (!%p1809_p10) }
  0x8a   : > { %v729_v5 = vcombine.low %v721_v28, %v728_v45  ;;  %v745_v21 = vrot.slane %v731_v6, %v2989_v58  ;;  %v755_v48 = vrot.slane %v747_v41, %v2989_v58  ;;  %v762_v59 = vrot.slane %v748_v46, %v2989_v58  ;;  %v866_v44 = vld [vmem:[%s3889_s1 + $0x180] sm:$0xff] (!%p1809_p10)  ;;  %v820_v10 = vld [vmem:[%s3889_s1 + $0x10] sm:$0xff] (!%p1809_p10)  ;;  %v821_v11 = vld [vmem:[%s3889_s1 + $0x18] sm:$0xff] (!%p1809_p10) }
  0x8b   : > { %v768_v24 = vrot.slane %v712_v15, 7  ;;  %v678_v47 = vcombine.low %v670_v16, %v677_v17  ;;  %v695_v32 = vcombine.low %v687_v22, %v694_v1  ;;  %v2097_v13 = vpack.c.bf16 (!%p1809_p10), %v835_v18, %v834_v51  ;;  %v850_v30 = vld [vmem:[%s3889_s1 + $0x100] sm:$0xff] (!%p1809_p10)  ;;  %v837_v17 = vld [vmem:[%s3889_s1 + $0x98] sm:$0xff] (!%p1809_p10)  ;;  %v868_v28 = vld [vmem:[%s3889_s1 + $0x190] sm:$0xff] (!%p1809_p10) }
  0x8c   : > { %v779_v63 = vrot.slane %v729_v5, 7  ;;  %v746_v29 = vcombine.low %v738_v20, %v745_v21  ;;  %v763_v37 = vcombine.low %v755_v48, %v762_v59  ;;  %v2099_v55 = vpack.c.bf16 (!%p1809_p10), %v819_v0, %v818_v19  ;;  %v869_v45 = vld [vmem:[%s3889_s1 + $0x198] sm:$0xff] (!%p1809_p10)  ;;  %v852_v15 = vld [vmem:[%s3889_s1 + $0x110] sm:$0xff] (!%p1809_p10)  ;;  %v838_v41 = vld [vmem:[%s3889_s1 + $0xa0] sm:$0xff] (!%p1809_p10) }
  0x8d   : > { %v770_v39 = vsel %vm769_vm0, %v768_v24, %v644_v33  ;;  %v2129_v49 = vpack.c.bf16 (!%p1809_p10), %v867_v27, %v866_v44  ;;  %2098 = vmatprep.subr.bf16.mxu0 (!%p1809_p10), %v2097_v13  ;;  %v2131_v16 = vpack.c.bf16 (!%p1809_p10), %v851_v54, %v850_v30  ;;  %v2101_v33 = vpack.c.bf16 (!%p1809_p10), %v837_v17, %v836_v40  ;;  %v853_v20 = vld [vmem:[%s3889_s1 + $0x118] sm:$0xff] (!%p1809_p10)  ;;  %v822_v46 = vld [vmem:[%s3889_s1 + $0x20] sm:$0xff] (!%p1809_p10)  ;;  %v823_v21 = vld [vmem:[%s3889_s1 + $0x28] sm:$0xff] (!%p1809_p10) }
  0x8e   : > { %v772_v43 = vsel %vm771_vm1, %v768_v24, %v770_v39  ;;  %v780_v9 = vsel %vm769_vm0, %v779_v63, %v661_v61  ;;  %v786_v26 = vrot.slane %v746_v29, 7  ;;  %v793_v3 = vrot.slane %v763_v37, 7  ;;  %2100 = vmatpush3.bf16.msra.mxu0 (!%p1809_p10), %v2099_v55  ;;  %v839_v61 = vld [vmem:[%s3889_s1 + $0xa8] sm:$0xff] (!%p1809_p10)  ;;  %v870_v48 = vld [vmem:[%s3889_s1 + $0x1a0] sm:$0xff] (!%p1809_p10)  ;;  %v840_v39 = vld [vmem:[%s3889_s1 + $0xb0] sm:$0xff] (!%p1809_p10) }
  0x8f   : > { %v774_v36 = vsel %vm773_vm2, %v768_v24, %v772_v43  ;;  %v781_v53 = vsel %vm771_vm1, %v779_v63, %v780_v9  ;;  %2130 = vmatprep.subr.bf16.mxu1 (!%p1809_p10), %v2129_v49  ;;  %v2103_v22 = vpack.c.bf16 (!%p1809_p10), %v821_v11, %v820_v10  ;;  %v2133_v6 = vpack.c.bf16 (!%p1809_p10), %v869_v45, %v868_v28  ;;  %v854_v59 = vld [vmem:[%s3889_s1 + $0x120] sm:$0xff] (!%p1809_p10)  ;;  %v825_v9 = vld [vmem:[%s3889_s1 + $0x38] sm:$0xff] (!%p1809_p10)  ;;  %v828_v19 = vld [vmem:[%s3889_s1 + $0x50] sm:$0xff] (!%p1809_p10) }
  0x90   : > { %v776_v60 = vsel %vm775_vm3, %v768_v24, %v774_v36  ;;  %v782_v62 = vsel %vm773_vm2, %v779_v63, %v781_v53  ;;  %v787_v12 = vsel %vm769_vm0, %v786_v26, %v678_v47  ;;  %v794_v2 = vsel %vm769_vm0, %v793_v3, %v695_v32  ;;  %813 = sbr.rel (%p1809_p10) target bundleno = 490 (0x1ea), region = 63  ;;  %2132 = vmatpush3.bf16.msra.mxu1 (!%p1809_p10), %v2131_v16  ;;  %v871_v24 = vld [vmem:[%s3889_s1 + $0x1a8] sm:$0xff] (!%p1809_p10)  ;;  %v824_v32 = vld [vmem:[%s3889_s1 + $0x30] sm:$0xff] (!%p1809_p10)  ;;  %v873_v36 = vld [vmem:[%s3889_s1 + $0x1b8] sm:$0xff] (!%p1809_p10) }
  0x91   : > { %v783_v52 = vsel %vm775_vm3, %v779_v63, %v782_v62  ;;  %v802_v23 = vadd.f32 %v776_v60, %v272_v8  ;;  %v788_v56 = vsel %vm771_vm1, %v786_v26, %v787_v12  ;;  %v795_v34 = vsel %vm771_vm1, %v793_v3, %v794_v2  ;;  %2102 = vmatprep.subr.bf16.mxu0 (!%p1809_p10), %v2101_v33  ;;  %v855_v63 = vld [vmem:[%s3889_s1 + $0x128] sm:$0xff] (!%p1809_p10)  ;;  %v841_v8 = vld [vmem:[%s3889_s1 + $0xb8] sm:$0xff] (!%p1809_p10)  ;;  %v842_v62 = vld [vmem:[%s3889_s1 + $0xc0] sm:$0xff] (!%p1809_p10) }
  0x92   : > { %v803_v57 = vadd.f32 %v783_v52, %v273_v38  ;;  %v789_v31 = vsel %vm773_vm2, %v786_v26, %v788_v56  ;;  %v796_v14 = vsel %vm773_vm2, %v793_v3, %v795_v34  ;;  %v2135_v1 = vpack.c.bf16 (!%p1809_p10), %v853_v20, %v852_v15  ;;  %2134 = vmatprep.subr.bf16.mxu1 (!%p1809_p10), %v2133_v6  ;;  %v872_v38 = vld [vmem:[%s3889_s1 + $0x1b0] sm:$0xff] (!%p1809_p10)  ;;  %v857_v60 = vld [vmem:[%s3889_s1 + $0x138] sm:$0xff] (!%p1809_p10)  ;;  %v874_v12 = vld [vmem:[%s3889_s1 + $0x1c0] sm:$0xff] (!%p1809_p10) }
  0x93   : > { %806 = vst [vmem:[#allocation2] sm:$0xff] %v802_v23  ;;  %v790_v4 = vsel %vm775_vm3, %v786_v26, %v789_v31  ;;  %v797_v7 = vsel %vm775_vm3, %v793_v3, %v796_v14  ;;  %v2105_v5 = vpack.c.bf16 (!%p1809_p10), %v839_v61, %v838_v41  ;;  %2104 = vmatpush3.bf16.msra.mxu0 (!%p1809_p10), %v2103_v22  ;;  %v856_v26 = vld [vmem:[%s3889_s1 + $0x130] sm:$0xff] (!%p1809_p10)  ;;  %v843_v3 = vld [vmem:[%s3889_s1 + $0xc8] sm:$0xff] (!%p1809_p10)  ;;  %v826_v2 = vld [vmem:[%s3889_s1 + $0x40] sm:$0xff] (!%p1809_p10)  ;;  %vm1729_vm4 = vcmask (!%p1809_p10), 33792  }
  0x94   : > { %807 = vst [vmem:[#allocation2 + $0x8] sm:$0xff] %v803_v57  ;;  %v804_v50 = vadd.f32 %v790_v4, %v274_v25  ;;  %v805_v35 = vadd.f32 %v797_v7, %v275_v42  ;;  %v2107_v47 = vpack.c.bf16 (!%p1809_p10), %v823_v21, %v822_v46  ;;  %v2137_v29 = vpack.c.bf16 (!%p1809_p10), %v871_v24, %v870_v48  ;;  %v875_v23 = vld [vmem:[%s3889_s1 + $0x1c8] sm:$0xff] (!%p1809_p10)  ;;  %v858_v42 = vld [vmem:[%s3889_s1 + $0x140] sm:$0xff] (!%p1809_p10)  ;;  %v844_v4 = vld [vmem:[%s3889_s1 + $0xd0] sm:$0xff] (!%p1809_p10) }
  0x95   : > { %2136 = vmatpush3.bf16.msra.mxu1 (!%p1809_p10), %v2135_v1  ;;  %2106 = vmatprep.subr.bf16.mxu0 (!%p1809_p10), %v2105_v5  ;;  %v2139_v37 = vpack.c.bf16 (!%p1809_p10), %v855_v63, %v854_v59  ;;  %v2109_v43 = vpack.c.bf16 (!%p1809_p10), %v841_v8, %v840_v39  ;;  %v2141_v53 = vpack.c.bf16 (!%p1809_p10), %v873_v36, %v872_v38  ;;  %v827_v57 = vld [vmem:[%s3889_s1 + $0x48] sm:$0xff] (!%p1809_p10)  ;;  %v845_v14 = vld [vmem:[%s3889_s1 + $0xd8] sm:$0xff] (!%p1809_p10)  ;;  %v876_v7 = vld [vmem:[%s3889_s1 + $0x1d0] sm:$0xff] (!%p1809_p10) }
  0x96   : > { %808 = vst [vmem:[#allocation2 + $0x10] sm:$0xff] %v804_v50  ;;  %809 = vst [vmem:[#allocation2 + $0x18] sm:$0xff] %v805_v35  ;;  %2138 = vmatprep.subr.bf16.mxu1 (!%p1809_p10), %v2137_v29  ;;  %v2111_v52 = vpack.c.bf16 (!%p1809_p10), %v825_v9, %v824_v32  ;;  %v2143_v25 = vpack.c.bf16 (!%p1809_p10), %v857_v60, %v856_v26  ;;  %v2113_v56 = vpack.c.bf16 (!%p1809_p10), %v843_v3, %v842_v62  ;;  %v859_v34 = vld [vmem:[%s3889_s1 + $0x148] sm:$0xff] (!%p1809_p10)  ;;  %v877_v50 = vld [vmem:[%s3889_s1 + $0x1d8] sm:$0xff] (!%p1809_p10) }
  0x97   : > { %2108 = vmatpush3.bf16.msra.mxu0 %v2107_v47  ;;  %v2145_v31 = vpack.c.bf16 %v875_v23, %v874_v12  ;;  %v2115_v35 = vpack.c.bf16 %v827_v57, %v826_v2  ;;  %v2147_v51 = vpack.c.bf16 %v859_v34, %v858_v42  ;;  %v2117_v18 = vpack.c.bf16 %v845_v14, %v844_v4  ;;  %v829_v13 = vld [vmem:[%s3889_s1 + $0x58] sm:$0xff]  ;;  %v860_v0 = vld [vmem:[%s3889_s1 + $0x150] sm:$0xff]  ;;  %v846_v55 = vld [vmem:[%s3889_s1 + $0xe0] sm:$0xff] }
  0x98   : > { %2110 = vmatprep.subr.bf16.mxu0 %v2109_v43  ;;  %v2149_v44 = vpack.c.bf16 %v877_v50, %v876_v7  ;;  %v861_v27 = vld [vmem:[%s3889_s1 + $0x158] sm:$0xff]  ;;  %v847_v49 = vld [vmem:[%s3889_s1 + $0xe8] sm:$0xff]  ;;  %v878_v30 = vld [vmem:[%s3889_s1 + $0x1e0] sm:$0xff]  ;;  %v2119_v40 = vpack.c.bf16 %v829_v13, %v828_v19 }
  0x99   : > { %2140 = vmatpush3.bf16.msra.mxu1 %v2139_v37  ;;  %v879_v54 = vld [vmem:[%s3889_s1 + $0x1e8] sm:$0xff]  ;;  %v830_v16 = vld [vmem:[%s3889_s1 + $0x60] sm:$0xff]  ;;  %v2151_v17 = vpack.c.bf16 %v861_v27, %v860_v0  ;;  %v2121_v10 = vpack.c.bf16 %v847_v49, %v846_v55  ;;  %v848_v15 = vld [vmem:[%s3889_s1 + $0xf0] sm:$0xff] }
  0x9a   : > { %2142 = vmatprep.subr.bf16.mxu1 %v2141_v53  ;;  %v831_v11 = vld [vmem:[%s3889_s1 + $0x68] sm:$0xff]  ;;  %v862_v33 = vld [vmem:[%s3889_s1 + $0x160] sm:$0xff]  ;;  %v2153_v28 = vpack.c.bf16 %v879_v54, %v878_v30  ;;  %v849_v6 = vld [vmem:[%s3889_s1 + $0xf8] sm:$0xff] }
  0x9b   : > { %2112 = vmatpush3.bf16.msra.mxu0 %v2111_v52  ;;  %v814_v22 = vld [vmem:[#allocation2] sm:$0xff]  ;;  %v863_v45 = vld [vmem:[%s3889_s1 + $0x168] sm:$0xff]  ;;  %v880_v61 = vld [vmem:[%s3889_s1 + $0x1f0] sm:$0xff]  ;;  %v2123_v5 = vpack.c.bf16 %v831_v11, %v830_v16  ;;  %v2125_v24 = vpack.c.bf16 %v849_v6, %v848_v15 }
  0x9c   : > { %2114 = vmatprep.subr.bf16.mxu0 %v2113_v56  ;;  %v1092_v20 = vrot.slane %v814_v22, %v2989_v58  ;;  %v1085_v41 = vcombine.high %v814_v22, %v814_v22  ;;  %v881_v1 = vld [vmem:[%s3889_s1 + $0x1f8] sm:$0xff]  ;;  %v2155_v48 = vpack.c.bf16 %v863_v45, %v862_v33  ;;  %v832_v59 = vld [vmem:[%s3889_s1 + $0x70] sm:$0xff]  ;;  %v898_v8 = vld [vmem:[%s3889_s1 + $0x280] sm:$0xff] }
  0x9d   : > { %2144 = vmatpush3.bf16.msra.mxu1 %v2143_v25  ;;  %v833_v63 = vld [vmem:[%s3889_s1 + $0x78] sm:$0xff]  ;;  %v864_v47 = vld [vmem:[%s3889_s1 + $0x170] sm:$0xff]  ;;  %v2157_v29 = vpack.c.bf16 %v881_v1, %v880_v61  ;;  %v899_v32 = vld [vmem:[%s3889_s1 + $0x288] sm:$0xff] }
  0x9e   : > { %2146 = vmatprep.subr.bf16.mxu1 %v2145_v31  ;;  %v1100_v46 = vcombine.high %v1092_v20, %v1092_v20  ;;  %v1099_v21 = vrot.slane %v1085_v41, %v2989_v58  ;;  %v865_v39 = vld [vmem:[%s3889_s1 + $0x178] sm:$0xff]  ;;  %v930_v43 = vld [vmem:[%s3889_s1 + $0x380] sm:$0xff]  ;;  %v931_v9 = vld [vmem:[%s3889_s1 + $0x388] sm:$0xff]  ;;  %v2127_v38 = vpack.c.bf16 %v833_v63, %v832_v59  ;;  %v2161_v53 = vpack.c.bf16 %v899_v32, %v898_v8 }
  0x9f   : > { %2116 = vmatpush3.bf16.msra.mxu0 %v2115_v35  ;;  %v2159_v36 = vpack.c.bf16 %v865_v39, %v864_v47  ;;  %v882_v26 = vld [vmem:[%s3889_s1 + $0x200] sm:$0xff]  ;;  %v883_v60 = vld [vmem:[%s3889_s1 + $0x208] sm:$0xff]  ;;  %v2193_v3 = vpack.c.bf16 %v931_v9, %v930_v43  ;;  %v900_v12 = vld [vmem:[%s3889_s1 + $0x290] sm:$0xff] }
  0xa0   : > { %2118 = vmatprep.subr.bf16.mxu0 %v2117_v18  ;;  %1233 = vmatprep.mubr.f32.mxu0 %v1100_v46  ;;  %v1101_v37 = vcombine.high %v1099_v21, %v1099_v21  ;;  %v914_v62 = vld [vmem:[%s3889_s1 + $0x300] sm:$0xff]  ;;  %v915_v52 = vld [vmem:[%s3889_s1 + $0x308] sm:$0xff]  ;;  %v901_v23 = vld [vmem:[%s3889_s1 + $0x298] sm:$0xff]  ;;  %v2163_v2 = vpack.c.bf16 %v883_v60, %v882_v26 }
  0xa1   : > { %2148 = vmatpush3.bf16.msra.mxu1 %v2147_v51  ;;  %v932_v25 = vld [vmem:[%s3889_s1 + $0x390] sm:$0xff]  ;;  %v933_v56 = vld [vmem:[%s3889_s1 + $0x398] sm:$0xff]  ;;  %v2195_v57 = vpack.c.bf16 %v915_v52, %v914_v62  ;;  %v2165_v42 = vpack.c.bf16 %v901_v23, %v900_v12  ;;  %v902_v50 = vld [vmem:[%s3889_s1 + $0x2a0] sm:$0xff] }
  0xa2   : > { %2150 = vmatprep.subr.bf16.mxu1 %v2149_v44  ;;  %1303 = vmatprep.mubr.f32.mxu1 %v1101_v37  ;;  %v884_v31 = vld [vmem:[%s3889_s1 + $0x210] sm:$0xff]  ;;  %v885_v34 = vld [vmem:[%s3889_s1 + $0x218] sm:$0xff]  ;;  %v2197_v14 = vpack.c.bf16 %v933_v56, %v932_v25  ;;  %v903_v35 = vld [vmem:[%s3889_s1 + $0x2a8] sm:$0xff] }
  0xa3   : > { %2120 = vmatpush3.bf16.msra.mxu0 %v2119_v40  ;;  %v916_v4 = vld [vmem:[%s3889_s1 + $0x310] sm:$0xff]  ;;  %v917_v7 = vld [vmem:[%s3889_s1 + $0x318] sm:$0xff]  ;;  %v934_v51 = vld [vmem:[%s3889_s1 + $0x3a0] sm:$0xff]  ;;  %v2167_v19 = vpack.c.bf16 %v885_v34, %v884_v31  ;;  %v2169_v0 = vpack.c.bf16 %v903_v35, %v902_v50 }
  0xa4   : > { %2122 = vmatprep.subr.bf16.mxu0 %v2121_v10  ;;  %v935_v18 = vld [vmem:[%s3889_s1 + $0x3a8] sm:$0xff]  ;;  %v2199_v13 = vpack.c.bf16 %v917_v7, %v916_v4  ;;  %v886_v44 = vld [vmem:[%s3889_s1 + $0x220] sm:$0xff]  ;;  %v904_v54 = vld [vmem:[%s3889_s1 + $0x2b0] sm:$0xff] }
  0xa5   : > { %2152 = vmatpush3.bf16.msra.mxu1 %v2151_v17  ;;  %v887_v27 = vld [vmem:[%s3889_s1 + $0x228] sm:$0xff]  ;;  %v918_v55 = vld [vmem:[%s3889_s1 + $0x320] sm:$0xff]  ;;  %v2201_v49 = vpack.c.bf16 %v935_v18, %v934_v51  ;;  %v905_v40 = vld [vmem:[%s3889_s1 + $0x2b8] sm:$0xff] }
  0xa6   : > { %2154 = vmatprep.subr.bf16.mxu1 %v2153_v28  ;;  %v919_v30 = vld [vmem:[%s3889_s1 + $0x328] sm:$0xff]  ;;  %v936_v16 = vld [vmem:[%s3889_s1 + $0x3b0] sm:$0xff]  ;;  %v937_v17 = vld [vmem:[%s3889_s1 + $0x3b8] sm:$0xff]  ;;  %v2171_v10 = vpack.c.bf16 %v887_v27, %v886_v44  ;;  %v2173_v33 = vpack.c.bf16 %v905_v40, %v904_v54 }
  0xa7   : > { %2124 = vmatpush3.bf16.msra.mxu0 %v2123_v5  ;;  %v2203_v11 = vpack.c.bf16 %v919_v30, %v918_v55  ;;  %v888_v22 = vld [vmem:[%s3889_s1 + $0x230] sm:$0xff]  ;;  %v889_v28 = vld [vmem:[%s3889_s1 + $0x238] sm:$0xff]  ;;  %v2205_v15 = vpack.c.bf16 %v937_v17, %v936_v16  ;;  %v907_v41 = vld [vmem:[%s3889_s1 + $0x2c8] sm:$0xff] }
  0xa8   : > { %2126 = vmatprep.subr.bf16.mxu0 %v2125_v24  ;;  %v920_v45 = vld [vmem:[%s3889_s1 + $0x330] sm:$0xff]  ;;  %v921_v6 = vld [vmem:[%s3889_s1 + $0x338] sm:$0xff]  ;;  %v938_v61 = vld [vmem:[%s3889_s1 + $0x3c0] sm:$0xff]  ;;  %v2175_v46 = vpack.c.bf16 %v889_v28, %v888_v22 }
  0xa9   : > { %2156 = vmatpush3.bf16.msra.mxu1 %v2155_v48  ;;  %v939_v1 = vld [vmem:[%s3889_s1 + $0x3c8] sm:$0xff]  ;;  %v2207_v24 = vpack.c.bf16 %v921_v6, %v920_v45  ;;  %v890_v63 = vld [vmem:[%s3889_s1 + $0x240] sm:$0xff]  ;;  %v908_v32 = vld [vmem:[%s3889_s1 + $0x2d0] sm:$0xff] }
  0xaa   : > { %2158 = vmatprep.subr.bf16.mxu1 %v2157_v29  ;;  %v815_v5 = vld [vmem:[#allocation2 + $0x8] sm:$0xff]  ;;  %v922_v29 = vld [vmem:[%s3889_s1 + $0x340] sm:$0xff]  ;;  %v2209_v39 = vpack.c.bf16 %v939_v1, %v938_v61  ;;  %v909_v37 = vld [vmem:[%s3889_s1 + $0x2d8] sm:$0xff] }
  0xab   : > { %2128 = vmatpush3.bf16.msra.mxu0 %v2127_v38  ;;  %v1102_v48 = vcombine.high %v815_v5, %v815_v5  ;;  %v891_v47 = vld [vmem:[%s3889_s1 + $0x248] sm:$0xff]  ;;  %v940_v38 = vld [vmem:[%s3889_s1 + $0x3d0] sm:$0xff]  ;;  %v2181_v62 = vpack.c.bf16 %v909_v37, %v908_v32  ;;  %v893_v52 = vld [vmem:[%s3889_s1 + $0x258] sm:$0xff] }
  0xac   : > { %2162 = vmatprep.subr.bf16.mxu0 %v2161_v53  ;;  %v923_v8 = vld [vmem:[%s3889_s1 + $0x348] sm:$0xff]  ;;  %v2179_v53 = vpack.c.bf16 %v891_v47, %v890_v63  ;;  %v924_v12 = vld [vmem:[%s3889_s1 + $0x350] sm:$0xff]  ;;  %v925_v25 = vld [vmem:[%s3889_s1 + $0x358] sm:$0xff] }
  0xad   : > { %2160 = vmatpush3.bf16.msra.mxu1 %v2159_v36  ;;  %v3362_v9 = vrot.slane %v1102_v48, %v2989_v58  ;;  %v941_v36 = vld [vmem:[%s3889_s1 + $0x3d8] sm:$0xff]  ;;  %v2211_v60 = vpack.c.bf16 %v923_v8, %v922_v29  ;;  %v910_v56 = vld [vmem:[%s3889_s1 + $0x2e0] sm:$0xff]  ;;  %v2215_v34 = vpack.c.bf16 %v925_v25, %v924_v12  ;;  %v895_v7 = vld [vmem:[%s3889_s1 + $0x268] sm:$0xff] }
  0xae   : > { %2194 = vmatprep.subr.bf16.mxu1 %v2193_v3  ;;  %1234 = vmatmul.mubr.f32.vlgmr.msra.gmra.mrb[0].mxu0 %v1092_v20  ;;  %v906_v20 = vld [vmem:[%s3889_s1 + $0x2c0] sm:$0xff]  ;;  %v892_v3 = vld [vmem:[%s3889_s1 + $0x250] sm:$0xff]  ;;  %v2213_v23 = vpack.c.bf16 %v941_v36, %v940_v38  ;;  %v927_v51 = vld [vmem:[%s3889_s1 + $0x368] sm:$0xff] }
  0xaf   : > { %2164 = vmatpush3.bf16.msra.mxu0 %v2163_v2  ;;  %v2177_v59 = vpack.c.bf16 %v907_v41, %v906_v20  ;;  %v1118_v26 = vcombine.high %v3362_v9, %v3362_v9  ;;  %v911_v2 = vld [vmem:[%s3889_s1 + $0x2e8] sm:$0xff]  ;;  %v2183_v31 = vpack.c.bf16 %v893_v52, %v892_v3  ;;  %v926_v50 = vld [vmem:[%s3889_s1 + $0x360] sm:$0xff]  ;;  %v912_v18 = vld [vmem:[%s3889_s1 + $0x2f0] sm:$0xff] }
  0xb0   : > { %1304 = vmatmul.mubr.f32.vlgmr.msra.gmra.mrb[0].mxu1 %v1099_v21  ;;  %2166 = vmatprep.subr.bf16.mxu0 %v2165_v42  ;;  %v3339_v21 = vrot.slane %v815_v5, %v2989_v58  ;;  %v943_v42 = vld [vmem:[%s3889_s1 + $0x3e8] sm:$0xff]  ;;  %v2185_v4 = vpack.c.bf16 %v911_v2, %v910_v56  ;;  %v2219_v27 = vpack.c.bf16 %v927_v51, %v926_v50  ;;  %v897_v30 = vld [vmem:[%s3889_s1 + $0x278] sm:$0xff]  ;;  %v928_v54 = vld [vmem:[%s3889_s1 + $0x370] sm:$0xff] }
  0xb1   : > { %2196 = vmatpush3.bf16.msra.mxu1 %v2195_v57  ;;  %1443 = vmatprep.mubr.f32.mxu1 %v1118_v26  ;;  %v942_v57 = vld [vmem:[%s3889_s1 + $0x3e0] sm:$0xff]  ;;  %v929_v16 = vld [vmem:[%s3889_s1 + $0x378] sm:$0xff]  ;;  %v947_v6 = vld [vmem:[%s3889_s1 + $0x408] sm:$0xff] }
  0xb2   : > { %2198 = vmatprep.subr.bf16.mxu1 %v2197_v14  ;;  %v1117_v43 = vcombine.high %v3339_v21, %v3339_v21  ;;  %v894_v14 = vld [vmem:[%s3889_s1 + $0x260] sm:$0xff]  ;;  %v2217_v35 = vpack.c.bf16 %v943_v42, %v942_v57  ;;  %v2223_v45 = vpack.c.bf16 %v929_v16, %v928_v54  ;;  %v979_v41 = vld [vmem:[%s3889_s1 + $0x508] sm:$0xff]  ;;  %v964_v1 = vld [vmem:[%s3889_s1 + $0x490] sm:$0xff] }
  0xb3   : > { %2168 = vmatpush3.bf16.msra.mxu0 %v2167_v19  ;;  %v913_v19 = vld [vmem:[%s3889_s1 + $0x2f8] sm:$0xff]  ;;  %v2187_v44 = vpack.c.bf16 %v895_v7, %v894_v14  ;;  %v962_v17 = vld [vmem:[%s3889_s1 + $0x480] sm:$0xff]  ;;  %v816_v63 = vld [vmem:[#allocation2 + $0x10] sm:$0xff] }
  0xb4   : > { %2170 = vmatprep.subr.bf16.mxu0 %v2169_v0  ;;  %1373 = vmatprep.mubr.f32.mxu0 %v1117_v43  ;;  %v945_v0 = vld [vmem:[%s3889_s1 + $0x3f8] sm:$0xff]  ;;  %v2189_v55 = vpack.c.bf16 %v913_v19, %v912_v18  ;;  %v946_v28 = vld [vmem:[%s3889_s1 + $0x400] sm:$0xff]  ;;  %v948_v29 = vld [vmem:[%s3889_s1 + $0x410] sm:$0xff]  ;;  %v3478_v32 = vrot.slane %v816_v63, %v2989_v58  ;;  %v1119_v37 = vcombine.high %v816_v63, %v816_v63 }
  0xb5   : > { %2200 = vmatpush3.bf16.msra.mxu1 %v2199_v13  ;;  %v944_v13 = vld [vmem:[%s3889_s1 + $0x3f0] sm:$0xff]  ;;  %v978_v20 = vld [vmem:[%s3889_s1 + $0x500] sm:$0xff]  ;;  %v965_v5 = vld [vmem:[%s3889_s1 + $0x498] sm:$0xff] }
  0xb6   : > { %2202 = vmatprep.subr.bf16.mxu1 %v2201_v49  ;;  %v896_v49 = vld [vmem:[%s3889_s1 + $0x270] sm:$0xff]  ;;  %v2221_v40 = vpack.c.bf16 %v945_v0, %v944_v13  ;;  %v997_v48 = vld [vmem:[%s3889_s1 + $0x598] sm:$0xff]  ;;  %v2229_v47 = vpack.c.bf16 %v965_v5, %v964_v1  ;;  %v966_v36 = vld [vmem:[%s3889_s1 + $0x4a0] sm:$0xff]  ;;  %v3499_v3 = vrot.slane %v1119_v37, %v2989_v58 }
  0xb7   : > { %2172 = vmatpush3.bf16.msra.mxu0 %v2171_v10  ;;  %v963_v10 = vld [vmem:[%s3889_s1 + $0x488] sm:$0xff]  ;;  %v2191_v22 = vpack.c.bf16 %v897_v30, %v896_v49  ;;  %v980_v8 = vld [vmem:[%s3889_s1 + $0x510] sm:$0xff]  ;;  %v981_v38 = vld [vmem:[%s3889_s1 + $0x518] sm:$0xff] }
  0xb8   : > { %2174 = vmatprep.subr.bf16.mxu0 %v2173_v33  ;;  %v995_v33 = vld [vmem:[%s3889_s1 + $0x588] sm:$0xff]  ;;  %v998_v26 = vld [vmem:[%s3889_s1 + $0x5a0] sm:$0xff]  ;;  %v968_v42 = vld [vmem:[%s3889_s1 + $0x4b0] sm:$0xff] }
  0xb9   : > { %2204 = vmatpush3.bf16.msra.mxu1 %v2203_v11  ;;  %v994_v11 = vld [vmem:[%s3889_s1 + $0x580] sm:$0xff]  ;;  %v951_v25 = vld [vmem:[%s3889_s1 + $0x428] sm:$0xff]  ;;  %v953_v51 = vld [vmem:[%s3889_s1 + $0x438] sm:$0xff] }
  0xba   : > { %2206 = vmatprep.subr.bf16.mxu1 %v2205_v15  ;;  %v2225_v15 = vpack.c.bf16 %v963_v10, %v962_v17  ;;  %v2257_v61 = vpack.c.bf16 %v995_v33, %v994_v11  ;;  %v982_v56 = vld [vmem:[%s3889_s1 + $0x520] sm:$0xff]  ;;  %v983_v57 = vld [vmem:[%s3889_s1 + $0x528] sm:$0xff]  ;;  %v984_v18 = vld [vmem:[%s3889_s1 + $0x530] sm:$0xff] }
  0xbb   : > { %2176 = vmatpush3.bf16.msra.mxu0 %v2175_v46  ;;  %v996_v46 = vld [vmem:[%s3889_s1 + $0x590] sm:$0xff]  ;;  %v2267_v7 = vpack.c.bf16 %v983_v57, %v982_v56  ;;  %v985_v13 = vld [vmem:[%s3889_s1 + $0x538] sm:$0xff]  ;;  %v970_v0 = vld [vmem:[%s3889_s1 + $0x4c0] sm:$0xff] }
  0xbc   : > { %2178 = vmatprep.subr.bf16.mxu0 %v2177_v59  ;;  %v2259_v59 = vpack.c.bf16 %v979_v41, %v978_v20  ;;  %v2261_v43 = vpack.c.bf16 %v997_v48, %v996_v46  ;;  %v2271_v30 = vpack.c.bf16 %v985_v13, %v984_v18  ;;  %v955_v16 = vld [vmem:[%s3889_s1 + $0x448] sm:$0xff]  ;;  %v986_v17 = vld [vmem:[%s3889_s1 + $0x540] sm:$0xff]  ;;  %v972_v33 = vld [vmem:[%s3889_s1 + $0x4d0] sm:$0xff] }
  0xbd   : > { %2208 = vmatpush3.bf16.msra.mxu1 %v2207_v24  ;;  %v2227_v24 = vpack.c.bf16 %v947_v6, %v946_v28  ;;  %v987_v11 = vld [vmem:[%s3889_s1 + $0x548] sm:$0xff]  ;;  %v1004_v28 = vld [vmem:[%s3889_s1 + $0x5d0] sm:$0xff]  ;;  %v989_v46 = vld [vmem:[%s3889_s1 + $0x558] sm:$0xff] }
  0xbe   : > { %2210 = vmatprep.subr.bf16.mxu1 %v2209_v39  ;;  %v949_v39 = vld [vmem:[%s3889_s1 + $0x418] sm:$0xff]  ;;  %v2275_v6 = vpack.c.bf16 %v987_v11, %v986_v17  ;;  %v956_v41 = vld [vmem:[%s3889_s1 + $0x450] sm:$0xff]  ;;  %v974_v48 = vld [vmem:[%s3889_s1 + $0x4e0] sm:$0xff] }
  0xbf   : > { %2180 = vmatpush3.bf16.msra.mxu0 %v2179_v53  ;;  %v967_v53 = vld [vmem:[%s3889_s1 + $0x4a8] sm:$0xff]  ;;  %v2231_v52 = vpack.c.bf16 %v949_v39, %v948_v29  ;;  %v988_v1 = vld [vmem:[%s3889_s1 + $0x550] sm:$0xff]  ;;  %v961_v56 = vld [vmem:[%s3889_s1 + $0x478] sm:$0xff] }
  0xc0   : > { %2182 = vmatprep.subr.bf16.mxu0 %v2181_v62  ;;  %v1134_v62 = vcombine.high %v3478_v32, %v3478_v32  ;;  %v2233_v12 = vpack.c.bf16 %v967_v53, %v966_v36  ;;  %v1007_v63 = vld [vmem:[%s3889_s1 + $0x5e8] sm:$0xff]  ;;  %v2279_v29 = vpack.c.bf16 %v989_v46, %v988_v1  ;;  %v976_v53 = vld [vmem:[%s3889_s1 + $0x4f0] sm:$0xff]  ;;  %v993_v57 = vld [vmem:[%s3889_s1 + $0x578] sm:$0xff] }
  0xc1   : > { %2212 = vmatpush3.bf16.msra.mxu1 %v2211_v60  ;;  %v999_v60 = vld [vmem:[%s3889_s1 + $0x5a8] sm:$0xff]  ;;  %v1013_v11 = vld [vmem:[%s3889_s1 + $0x618] sm:$0xff] }
  0xc2   : > { %2214 = vmatprep.subr.bf16.mxu1 %v2213_v23  ;;  %v950_v23 = vld [vmem:[%s3889_s1 + $0x420] sm:$0xff]  ;;  %v2265_v2 = vpack.c.bf16 %v999_v60, %v998_v26  ;;  %v959_v37 = vld [vmem:[%s3889_s1 + $0x468] sm:$0xff]  ;;  %v977_v26 = vld [vmem:[%s3889_s1 + $0x4f8] sm:$0xff] }
  0xc3   : > { %2184 = vmatpush3.bf16.msra.mxu0 %v2183_v31  ;;  %v969_v31 = vld [vmem:[%s3889_s1 + $0x4b8] sm:$0xff]  ;;  %v2235_v14 = vpack.c.bf16 %v951_v25, %v950_v23  ;;  %v991_v36 = vld [vmem:[%s3889_s1 + $0x568] sm:$0xff]  ;;  %v1008_v60 = vld [vmem:[%s3889_s1 + $0x5f0] sm:$0xff]  ;;  %v2253_v23 = vpack.c.bf16 %v977_v26, %v976_v53 }
  0xc4   : > { %2186 = vmatprep.subr.bf16.mxu0 %v2185_v4  ;;  %v1001_v4 = vld [vmem:[%s3889_s1 + $0x5b8] sm:$0xff]  ;;  %v2237_v50 = vpack.c.bf16 %v969_v31, %v968_v42  ;;  %v960_v25 = vld [vmem:[%s3889_s1 + $0x470] sm:$0xff]  ;;  %v1026_v42 = vld [vmem:[%s3889_s1 + $0x680] sm:$0xff] }
  0xc5   : > { %2216 = vmatpush3.bf16.msra.mxu1 %v2215_v34  ;;  %v1000_v34 = vld [vmem:[%s3889_s1 + $0x5b0] sm:$0xff]  ;;  %v1027_v31 = vld [vmem:[%s3889_s1 + $0x688] sm:$0xff]  ;;  %v1049_v26 = vld [vmem:[%s3889_s1 + $0x738] sm:$0xff] }
  0xc6   : > { %2218 = vmatprep.subr.bf16.mxu1 %v2217_v35  ;;  %v952_v35 = vld [vmem:[%s3889_s1 + $0x430] sm:$0xff]  ;;  %v2269_v19 = vpack.c.bf16 %v1001_v4, %v1000_v34  ;;  %v1058_v34 = vld [vmem:[%s3889_s1 + $0x780] sm:$0xff]  ;;  %v1059_v4 = vld [vmem:[%s3889_s1 + $0x788] sm:$0xff] }
  0xc7   : > { %2188 = vmatpush3.bf16.msra.mxu0 %v2187_v44  ;;  %v971_v44 = vld [vmem:[%s3889_s1 + $0x4c8] sm:$0xff]  ;;  %v2239_v49 = vpack.c.bf16 %v953_v51, %v952_v35  ;;  %v2289_v35 = vpack.c.bf16 %v1027_v31, %v1026_v42  ;;  %v1010_v51 = vld [vmem:[%s3889_s1 + $0x600] sm:$0xff]  ;;  %v2321_v13 = vpack.c.bf16 %v1059_v4, %v1058_v34  ;;  %v1036_v31 = vld [vmem:[%s3889_s1 + $0x6d0] sm:$0xff] }
  0xc8   : > { %2190 = vmatprep.subr.bf16.mxu0 %v2189_v55  ;;  %v1003_v55 = vld [vmem:[%s3889_s1 + $0x5c8] sm:$0xff]  ;;  %v2241_v54 = vpack.c.bf16 %v971_v44, %v970_v0  ;;  %v1028_v44 = vld [vmem:[%s3889_s1 + $0x690] sm:$0xff]  ;;  %v1037_v34 = vld [vmem:[%s3889_s1 + $0x6d8] sm:$0xff] }
  0xc9   : > { %2220 = vmatpush3.bf16.msra.mxu1 %v2219_v27  ;;  %v1002_v27 = vld [vmem:[%s3889_s1 + $0x5c0] sm:$0xff]  ;;  %v1011_v18 = vld [vmem:[%s3889_s1 + $0x608] sm:$0xff]  ;;  %v1068_v4 = vld [vmem:[%s3889_s1 + $0x7d0] sm:$0xff] }
  0xca   : > { %2222 = vmatprep.subr.bf16.mxu1 %v2221_v40  ;;  %v954_v40 = vld [vmem:[%s3889_s1 + $0x440] sm:$0xff]  ;;  %v2273_v10 = vpack.c.bf16 %v1003_v55, %v1002_v27  ;;  %v1043_v0 = vld [vmem:[%s3889_s1 + $0x708] sm:$0xff]  ;;  %v1029_v27 = vld [vmem:[%s3889_s1 + $0x698] sm:$0xff] }
  0xcb   : > { %2192 = vmatpush3.bf16.msra.mxu0 %v2191_v22  ;;  %v973_v22 = vld [vmem:[%s3889_s1 + $0x4d8] sm:$0xff]  ;;  %v2293_v17 = vpack.c.bf16 %v1029_v27, %v1028_v44  ;;  %v1015_v46 = vld [vmem:[%s3889_s1 + $0x628] sm:$0xff]  ;;  %v1038_v44 = vld [vmem:[%s3889_s1 + $0x6e0] sm:$0xff] }
  0xcc   : > { %2226 = vmatprep.subr.bf16.mxu0 %v2225_v15  ;;  %v2243_v15 = vpack.c.bf16 %v955_v16, %v954_v40  ;;  %v2245_v20 = vpack.c.bf16 %v973_v22, %v972_v33  ;;  %v2291_v40 = vpack.c.bf16 %v1011_v18, %v1010_v51  ;;  %v1044_v33 = vld [vmem:[%s3889_s1 + $0x710] sm:$0xff]  ;;  %v1045_v22 = vld [vmem:[%s3889_s1 + $0x718] sm:$0xff]  ;;  %v1051_v42 = vld [vmem:[%s3889_s1 + $0x748] sm:$0xff] }
  0xcd   : > { %2224 = vmatpush3.bf16.msra.mxu1 %v2223_v45  ;;  %v1005_v45 = vld [vmem:[%s3889_s1 + $0x5d8] sm:$0xff]  ;;  %v2327_v1 = vpack.c.bf16 %v1045_v22, %v1044_v33  ;;  %v1020_v51 = vld [vmem:[%s3889_s1 + $0x650] sm:$0xff]  ;;  %v1039_v27 = vld [vmem:[%s3889_s1 + $0x6e8] sm:$0xff] }
  0xce   : > { %2258 = vmatprep.subr.bf16.mxu1 %v2257_v61  ;;  %1374 = vmatmul.mubr.f32.vlgmr.msra.gmra.mrb[2].mxu0 %v3339_v21  ;;  %v2263_v21 = vpack.c.bf16 %v981_v38, %v980_v8  ;;  %v957_v61 = vld [vmem:[%s3889_s1 + $0x458] sm:$0xff]  ;;  %v2277_v5 = vpack.c.bf16 %v1005_v45, %v1004_v28  ;;  %v958_v8 = vld [vmem:[%s3889_s1 + $0x460] sm:$0xff]  ;;  %v1031_v45 = vld [vmem:[%s3889_s1 + $0x6a8] sm:$0xff] }
  0xcf   : > { %2228 = vmatpush3.bf16.msra.mxu0 %v2227_v24  ;;  %1513 = vmatprep.mubr.f32.mxu0 %v1134_v62  ;;  %v975_v24 = vld [vmem:[%s3889_s1 + $0x4e8] sm:$0xff]  ;;  %v1009_v62 = vld [vmem:[%s3889_s1 + $0x5f8] sm:$0xff]  ;;  %v1030_v28 = vld [vmem:[%s3889_s1 + $0x6a0] sm:$0xff] }
  0xd0   : > { %1444 = vmatmul.mubr.f32.vlgmr.msra.gmra.mrb[2].mxu1 %v3362_v9  ;;  %2230 = vmatprep.subr.bf16.mxu0 %v2229_v47  ;;  %v1135_v9 = vcombine.high %v3499_v3, %v3499_v3  ;;  %v2247_v47 = vpack.c.bf16 %v957_v61, %v956_v41  ;;  %v2249_v39 = vpack.c.bf16 %v975_v24, %v974_v48  ;;  %v1046_v48 = vld [vmem:[%s3889_s1 + $0x720] sm:$0xff]  ;;  %v1021_v18 = vld [vmem:[%s3889_s1 + $0x658] sm:$0xff]  ;;  %v1055_v22 = vld [vmem:[%s3889_s1 + $0x768] sm:$0xff] }
  0xd1   : > { %2260 = vmatpush3.bf16.msra.mxu1 %v2259_v59  ;;  %v1006_v59 = vld [vmem:[%s3889_s1 + $0x5e0] sm:$0xff] }
  0xd2   : > { %2262 = vmatprep.subr.bf16.mxu1 %v2261_v43  ;;  %1583 = vmatprep.mubr.f32.mxu1 %v1135_v9  ;;  %v990_v43 = vld [vmem:[%s3889_s1 + $0x560] sm:$0xff]  ;;  %v2281_v38 = vpack.c.bf16 %v1007_v63, %v1006_v59  ;;  %v992_v9 = vld [vmem:[%s3889_s1 + $0x570] sm:$0xff]  ;;  %v1033_v63 = vld [vmem:[%s3889_s1 + $0x6b8] sm:$0xff] }
  0xd3   : > { %2232 = vmatpush3.bf16.msra.mxu0 %v2231_v52  ;;  %v2251_v52 = vpack.c.bf16 %v959_v37, %v958_v8  ;;  %v1032_v59 = vld [vmem:[%s3889_s1 + $0x6b0] sm:$0xff]  ;;  %v1054_v33 = vld [vmem:[%s3889_s1 + $0x760] sm:$0xff] }
  0xd4   : > { %2234 = vmatprep.subr.bf16.mxu0 %v2233_v12  ;;  %v2283_v12 = vpack.c.bf16 %v991_v36, %v990_v43  ;;  %v2301_v37 = vpack.c.bf16 %v1033_v63, %v1032_v59  ;;  %v1016_v43 = vld [vmem:[%s3889_s1 + $0x630] sm:$0xff]  ;;  %v1810_v63 = vld [vmem:[%s3890_s2] ss:$0 sm:$0xff] }
  0xd5   : > { %2264 = vmatpush3.bf16.msra.mxu1 %v2263_v21  ;;  %v817_v21 = vld [vmem:[#allocation2 + $0x18] sm:$0xff]  ;;  %v1048_v36 = vld [vmem:[%s3889_s1 + $0x730] sm:$0xff] }
  0xd6   : > { %2266 = vmatprep.subr.bf16.mxu1 %v2265_v2  ;;  %v2285_v2 = vpack.c.bf16 %v1009_v62, %v1008_v60  ;;  %v3667_v55 = vrot.slane %v817_v21, %v2989_v58  ;;  %v1034_v60 = vld [vmem:[%s3889_s1 + $0x6c0] sm:$0xff]  ;;  %v1035_v62 = vld [vmem:[%s3889_s1 + $0x6c8] sm:$0xff] }
  0xd7   : > { %2236 = vmatpush3.bf16.msra.mxu0 %v2235_v14  ;;  %v1136_v14 = vcombine.high %v817_v21, %v817_v21  ;;  %v1067_v21 = vld [vmem:[%s3889_s1 + $0x7c8] sm:$0xff] }
  0xd8   : > { %2238 = vmatprep.subr.bf16.mxu0 %v2237_v50  ;;  %v2287_v50 = vpack.c.bf16 %v993_v57, %v992_v9  ;;  %v1019_v9 = vld [vmem:[%s3889_s1 + $0x648] sm:$0xff] }
  0xd9   : > { %2268 = vmatpush3.bf16.msra.mxu1 %v2267_v7  ;;  %v2255_v7 = vpack.c.bf16 %v961_v56, %v960_v25  ;;  %v2305_v25 = vpack.c.bf16 %v1035_v62, %v1034_v60  ;;  %v1018_v56 = vld [vmem:[%s3889_s1 + $0x640] sm:$0xff] }
  0xda   : > { %2270 = vmatprep.subr.bf16.mxu1 %v2269_v19  ;;  %v1042_v19 = vld [vmem:[%s3889_s1 + $0x700] sm:$0xff] }
  0xdb   : > { %2240 = vmatpush3.bf16.msra.mxu0 %v2239_v49  ;;  %v1060_v49 = vld [vmem:[%s3889_s1 + $0x790] sm:$0xff]  ;;  %v2323_v16 = vpack.c.bf16 %v1043_v0, %v1042_v19  ;;  %v1053_v0 = vld [vmem:[%s3889_s1 + $0x758] sm:$0xff] }
  0xdc   : > { %2242 = vmatprep.subr.bf16.mxu0 %v2241_v54  ;;  %v3676_v54 = vrot.slane %v1136_v14, %v2989_v58  ;;  %v1069_v14 = vld [vmem:[%s3889_s1 + $0x7d8] sm:$0xff]  ;;  %v1052_v19 = vld [vmem:[%s3889_s1 + $0x750] sm:$0xff] }
  0xdd   : > { %2272 = vmatpush3.bf16.msra.mxu1 %v2271_v30  ;;  %v1061_v30 = vld [vmem:[%s3889_s1 + $0x798] sm:$0xff] }
  0xde   : > { %2274 = vmatprep.subr.bf16.mxu1 %v2273_v10  ;;  %v1012_v10 = vld [vmem:[%s3889_s1 + $0x610] sm:$0xff]  ;;  %v2325_v58 = vpack.c.bf16 %v1061_v30, %v1060_v49  ;;  %v1152_v41 = vcombine.high %v3676_v54, %v3676_v54  ;;  %v1070_v49 = vld [vmem:[%s3889_s1 + $0x7e0] sm:$0xff]  ;;  %v1071_v30 = vld [vmem:[%s3889_s1 + $0x7e8] sm:$0xff] }
  0xdf   : > { %2244 = vmatpush3.bf16.msra.mxu0 %v2243_v15  ;;  %v1151_v15 = vcombine.high %v3667_v55, %v3667_v55  ;;  %v2295_v61 = vpack.c.bf16 %v1013_v11, %v1012_v10  ;;  %v1022_v10 = vld [vmem:[%s3889_s1 + $0x660] sm:$0xff]  ;;  %v1023_v11 = vld [vmem:[%s3889_s1 + $0x668] sm:$0xff] }
  0xe0   : > { %2246 = vmatprep.subr.bf16.mxu0 %v2245_v20  ;;  %v1063_v20 = vld [vmem:[%s3889_s1 + $0x7a8] sm:$0xff] }
  0xe1   : > { %2276 = vmatpush3.bf16.msra.mxu1 %v2275_v6  ;;  %v1062_v6 = vld [vmem:[%s3889_s1 + $0x7a0] sm:$0xff] }
  0xe2   : > { %2278 = vmatprep.subr.bf16.mxu1 %v2277_v5  ;;  %v2297_v5 = vpack.c.bf16 %v1031_v45, %v1030_v28  ;;  %v2329_v24 = vpack.c.bf16 %v1063_v20, %v1062_v6  ;;  %v1040_v28 = vld [vmem:[%s3889_s1 + $0x6f0] sm:$0xff]  ;;  %v1041_v45 = vld [vmem:[%s3889_s1 + $0x6f8] sm:$0xff]  ;;  %v2315_v20 = vpack.c.bf16 %v1023_v11, %v1022_v10 }
  0xe3   : > { %2248 = vmatpush3.bf16.msra.mxu0 %v2247_v47  ;;  %v1064_v47 = vld [vmem:[%s3889_s1 + $0x7b0] sm:$0xff]  ;;  %v1073_v6 = vld [vmem:[%s3889_s1 + $0x7f8] sm:$0xff] }
  0xe4   : > { %2250 = vmatprep.subr.bf16.mxu0 %v2249_v39 }
  0xe5   : > { %2280 = vmatpush3.bf16.msra.mxu1 %v2279_v29  ;;  %v1065_v29 = vld [vmem:[%s3889_s1 + $0x7b8] sm:$0xff] }
  0xe6   : > { %2282 = vmatprep.subr.bf16.mxu1 %v2281_v38  ;;  %v1017_v38 = vld [vmem:[%s3889_s1 + $0x638] sm:$0xff]  ;;  %v2333_v53 = vpack.c.bf16 %v1065_v29, %v1064_v47 }
  0xe7   : > { %2252 = vmatpush3.bf16.msra.mxu0 %v2251_v52  ;;  %v1066_v52 = vld [vmem:[%s3889_s1 + $0x7c0] sm:$0xff] }
  0xe8   : > { %2254 = vmatprep.subr.bf16.mxu0 %v2253_v23  ;;  %v2335_v23 = vpack.c.bf16 %v1049_v26, %v1048_v36  ;;  %v2337_v57 = vpack.c.bf16 %v1067_v21, %v1066_v52 }
  0xe9   : > { %2284 = vmatpush3.bf16.msra.mxu1 %v2283_v12  ;;  %v2303_v12 = vpack.c.bf16 %v1017_v38, %v1016_v43 }
  0xea   : > { %2286 = vmatprep.subr.bf16.mxu1 %v2285_v2  ;;  %v1050_v2 = vld [vmem:[%s3889_s1 + $0x740] sm:$0xff] }
  0xeb   : > { %2256 = vmatpush3.bf16.msra.mxu0 %v2255_v7  ;;  %v2307_v7 = vpack.c.bf16 %v1019_v9, %v1018_v56 }
  0xec   : > { %2290 = vmatprep.subr.bf16.mxu0 %v2289_v35  ;;  %v2309_v35 = vpack.c.bf16 %v1037_v34, %v1036_v31 }
  0xed   : > { %2288 = vmatpush3.bf16.msra.mxu1 %v2287_v50  ;;  %v2339_v50 = vpack.c.bf16 %v1051_v42, %v1050_v2 }
  0xee   : > { %2322 = vmatprep.subr.bf16.mxu1 %v2321_v13  ;;  %1514 = vmatmul.mubr.f32.vlgmr.msra.gmra.mrb[4].mxu0 %v3478_v32  ;;  %v1014_v32 = vld [vmem:[%s3889_s1 + $0x620] sm:$0xff]  ;;  %v2341_v13 = vpack.c.bf16 %v1069_v14, %v1068_v4 }
  0xef   : > { %2292 = vmatpush3.bf16.msra.mxu0 %v2291_v40  ;;  %1653 = vmatprep.mubr.f32.mxu0 %v1151_v15  ;;  %v2299_v39 = vpack.c.bf16 %v1015_v46, %v1014_v32  ;;  %v2311_v40 = vpack.c.bf16 %v1021_v18, %v1020_v51  ;;  %v1072_v15 = vld [vmem:[%s3889_s1 + $0x7f0] sm:$0xff] }
  0xf0   : > { %1584 = vmatmul.mubr.f32.vlgmr.msra.gmra.mrb[4].mxu1 %v3499_v3  ;;  %2294 = vmatprep.subr.bf16.mxu0 %v2293_v17  ;;  %v1047_v3 = vld [vmem:[%s3889_s1 + $0x728] sm:$0xff]  ;;  %v2313_v17 = vpack.c.bf16 %v1039_v27, %v1038_v44  ;;  %v2349_v32 = vpack.c.bf16 %v1073_v6, %v1072_v15  ;;  %v1056_v46 = vld [vmem:[%s3889_s1 + $0x770] sm:$0xff] }
  0xf1   : > { %2324 = vmatpush3.bf16.msra.mxu1 %v2323_v16  ;;  %1723 = vmatprep.mubr.f32.mxu1 %v1152_v41  ;;  %v2331_v8 = vpack.c.bf16 %v1047_v3, %v1046_v48  ;;  %v2343_v16 = vpack.c.bf16 %v1053_v0, %v1052_v19  ;;  %v2347_v41 = vpack.c.bf16 %v1055_v22, %v1054_v33  ;;  %v1057_v48 = vld [vmem:[%s3889_s1 + $0x778] sm:$0xff] }
  0xf2   : > { %2326 = vmatprep.subr.bf16.mxu1 %v2325_v58  ;;  %v2345_v58 = vpack.c.bf16 %v1071_v30, %v1070_v49  ;;  %v2351_v3 = vpack.c.bf16 %v1057_v48, %v1056_v46 }
  0xf3   : > { %2296 = vmatpush3.bf16.msra.mxu0 %v2295_v61  ;;  %v2317_v61 = vpack.c.bf16 %v1041_v45, %v1040_v28 }
  0xf4   : > { %2298 = vmatprep.subr.bf16.mxu0 %v2297_v5  ;;  %v1025_v5 = vld [vmem:[%s3889_s1 + $0x678] sm:$0xff] }
  0xf5   : > { %2328 = vmatpush3.bf16.msra.mxu1 %v2327_v1  ;;  %v1024_v1 = vld [vmem:[%s3889_s1 + $0x670] sm:$0xff] }
  0xf6   : > { %2330 = vmatprep.subr.bf16.mxu1 %v2329_v24  ;;  %v2319_v24 = vpack.c.bf16 %v1025_v5, %v1024_v1 }
  0xf7   : > { %2300 = vmatpush3.bf16.msra.mxu0 %v2299_v39 }
  0xf8   : > { %2302 = vmatprep.subr.bf16.mxu0 %v2301_v37 }
  0xf9   : > { %2332 = vmatpush3.bf16.msra.mxu1 %v2331_v8 }
  0xfa   : > { %2334 = vmatprep.subr.bf16.mxu1 %v2333_v53 }
  0xfb   : > { %2304 = vmatpush3.bf16.msra.mxu0 %v2303_v12 }
  0xfc   : > { %2306 = vmatprep.subr.bf16.mxu0 %v2305_v25 }
  0xfd   : > { %2336 = vmatpush3.bf16.msra.mxu1 %v2335_v23 }
  0xfe   : > { %2338 = vmatprep.subr.bf16.mxu1 %v2337_v57 }
  0xff   : > { %2308 = vmatpush3.bf16.msra.mxu0 %v2307_v7 }
 0x100   : > { %2310 = vmatprep.subr.bf16.mxu0 %v2309_v35 }
 0x101   : > { %2340 = vmatpush3.bf16.msra.mxu1 %v2339_v50 }
 0x102   : > { %2342 = vmatprep.subr.bf16.mxu1 %v2341_v13 }
 0x103   : > { %2312 = vmatpush3.bf16.msra.mxu0 %v2311_v40 }
 0x104   : > { %2314 = vmatprep.subr.bf16.mxu0 %v2313_v17 }
 0x105   : > { %2344 = vmatpush3.bf16.msra.mxu1 %v2343_v16 }
 0x106   : > { %2346 = vmatprep.subr.bf16.mxu1 %v2345_v58 }
 0x107   : > { %2316 = vmatpush3.bf16.msra.mxu0 %v2315_v20 }
 0x108   : > { %2318 = vmatprep.subr.bf16.mxu0 %v2317_v61 }
 0x109   : > { %2348 = vmatpush3.bf16.msra.mxu1 %v2347_v41 }
 0x10a   : > { %2350 = vmatprep.subr.bf16.mxu1 %v2349_v32 }
 0x10b   : > { %2320 = vmatpush3.bf16.msra.mxu0 %v2319_v24 }
 0x10d   : > { %2352 = vmatpush3.bf16.msra.mxu1 %v2351_v3 }
 0x10e   : > { %1654 = vmatmul.mubr.f32.vlgmr.msra.gmra.mrb[6].mxu0 %v3667_v55 }
 0x110   : > { %1724 = vmatmul.mubr.f32.vlgmr.msra.gmra.mrb[6].mxu1 %v3676_v54 }
 0x181   : > { %v1849_v59 = vpop.f32.mrb[0].mxu0 }
 0x182   : > { %v1850_v47 = vpop.f32.mrb[1].mxu0 }
 0x183   : > { %v1884_v29 = vpop.f32.mrb[0].mxu1  ;;  %v1851_v39 = vadd.f32 %v1850_v47, %v1849_v59 }
 0x184   : > { %v1885_v8 = vpop.f32.mrb[1].mxu1 }
 0x185   : > { %v1886_v37 = vadd.f32 %v1885_v8, %v1884_v29  ;;  %v1236_v43 = vadd.f32 %v1851_v39, %v1810_v63 }
 0x187   : > { %v1306_v38 = vadd.f32 %v1886_v37, %v1236_v43 }
 0x1a1   : > { %v1919_v36 = vpop.f32.mrb[2].mxu0 }
 0x1a2   : > { %v1920_v53 = vpop.f32.mrb[3].mxu0 }
 0x1a3   : > { %v1954_v26 = vpop.f32.mrb[2].mxu1  ;;  %v1921_v60 = vadd.f32 %v1920_v53, %v1919_v36 }
 0x1a4   : > { %v1955_v62 = vpop.f32.mrb[3].mxu1 }
 0x1a5   : > { %v1956_v55 = vadd.f32 %v1955_v62, %v1954_v26  ;;  %v1376_v52 = vadd.f32 %v1921_v60, %v1306_v38 }
 0x1a7   : > { %v1446_v54 = vadd.f32 %v1956_v55, %v1376_v52 }
 0x1c1   : > { %v1989_v21 = vpop.f32.mrb[4].mxu0 }
 0x1c2   : > { %v1990_v12 = vpop.f32.mrb[5].mxu0 }
 0x1c3   : > { %v2024_v23 = vpop.f32.mrb[4].mxu1  ;;  %v1991_v25 = vadd.f32 %v1990_v12, %v1989_v21 }
 0x1c4   : > { %v2025_v56 = vpop.f32.mrb[5].mxu1 }
 0x1c5   : > { %v2026_v9 = vadd.f32 %v2025_v56, %v2024_v23  ;;  %v1516_v2 = vadd.f32 %v1991_v25, %v1446_v54 }
 0x1c7   : > { %v1586_v57 = vadd.f32 %v2026_v9, %v1516_v2 }
 0x1e1   : > { %v2059_v42 = vpop.f32.mrb[6].mxu0 }
 0x1e2   : > { %v2060_v31 = vpop.f32.mrb[7].mxu0 }
 0x1e3   : > { %v2094_v34 = vpop.f32.mrb[6].mxu1  ;;  %v2061_v4 = vadd.f32 %v2060_v31, %v2059_v42 }
 0x1e4   : > { %v2095_v14 = vpop.f32.mrb[7].mxu1 }
 0x1e5   : > { %v2096_v7 = vadd.f32 %v2095_v14, %v2094_v34  ;;  %v1656_v50 = vadd.f32 %v2061_v4, %v1586_v57 }
 0x1e7   : > { %v1726_v35 = vadd.f32 %v2096_v7, %v1656_v50 }
 0x1e9   : > { %1730 = vst.msk [vmem:[#allocation4] sm:$0x3] %vm1729_vm4, %v1726_v35 }
 0x1ea PF: > { %p3847_p11 = scmp.eq.s32.totalorder %s1799_s17, 3  ;;  %s2478_s22 = smov [#allocation4]  }
 0x1eb   : > { %s1740_s23 = sshll.u32 %s2478_s22, 4  ;;  %s1741_s23 = int_to_ptr.vmem [resolvable:$true] %s1740_s23 }
 0x1ec   : > { %s2406_s24 = scalar_lea.vmem %s1741_s23, 32  ;;  %p2413_p1 = scmp.lt.s32.totalorder %s1741_s23, %s1741_s23 }
 0x1ed   : > { %p2407_p12 = scmp.ne.s32.totalorder %s1741_s23, %s2406_s24  ;;  %p2414_p2 = scmp.lt.s32.totalorder %s2406_s24, %s2406_s24 }
 0x1ef   : > { %p2408_p13 = pnand %p2407_p12, %p3847_p11  ;;  %p2415_p3 = por %p2414_p2, %p2413_p1 }
 0x1f1   : > { %p2409_p0 = pneg %p2408_p13 }
 0x1f3   : > { %p2416_p4 = pnand %p2415_p3, %p2409_p0 }
 0x1f5   : > { %2419 = shalt.err (!%p2416_p4)
}
 0x1f6   : > { %s2420_s17 = scalar_lea.hbm %s3891_s3, 32 }
 0x1f7   : > { %p2421_p5 = scmp.ne.s32.totalorder %s3891_s3, %s2420_s17  ;;  %p2426_p8 = scmp.lt.u32.totalorder %s2420_s17, %s3891_s3 }
 0x1f9   : > { %p2422_p6 = pnand %p2421_p5, %p3847_p11 }
 0x1fb   : > { %p2423_p7 = pneg %p2422_p6 }
 0x1fd   : > { %p2428_p9 = pnand %p2426_p8, %p2423_p7 }
 0x1ff   : > { %2431 = shalt.err (!%p2428_p9)
}
 0x200   : > { %2354 = dma.vmem_to_hbm [thread:$0]  (%p3847_p11), %s1741_s23, 32, %s3891_s3, [#allocation5]  }
 0x201   : > { %2453 = dma.done.wait (%p3847_p11), [#allocation5], 32  }
 0x202   : > { %2455 = vsyncadd (%p3847_p11), [#allocation5], 4294967264 }
 0x203 PF: > { %s14_s16 = sadd.s32 1, %s2474_s16   ;;  %s3936_s12 = smov %s2462_s13 }
 0x204   : > { %p11_p10 = scmp.ge.s32.totalorder %s14_s16, 6   ;;  %s3937_s13 = smov %s2535_s21 }
 0x205   : > { %s3938_s14 = smov %s2470_s15  ;;  %s3939_s15 = smov %s3941_s18 }
 0x206   :  { %13 = sbr.rel (!%p11_p10) target bundleno = 3 (0x3), region = 96 }
 0x20d   :  { %1753 = vsyncpa [#allocation5], 1 }
 0x20e   :  { %1755 = vsyncpa [#allocation5 + $0x1], 1 }

</bundles_post_ra>
